<compile_context>
chip_gen: v5e
topology: v5e:2x2
jax: 0.10.0
libtpu: 0.0.40
codegen_flags: <defaults>
</compile_context>

<pallas_src>
import functools
import math

import jax
import jax.numpy as jnp
from jax.experimental import pallas as pl
from jax.experimental.pallas import tpu as pltpu


def _layer_norm(y, gamma, beta, eps=1e-6):
    # PyTorch nn.LayerNorm (eps=1e-06): biased variance.
    mean = jnp.mean(y, axis=-1, keepdims=True)
    var = jnp.mean((y - mean) ** 2, axis=-1, keepdims=True)
    return (y - mean) * jax.lax.rsqrt(var + eps) * gamma + beta


def fused_encoder_kernel(x_ref,
                         wqkv_ref, bqkv_ref, wo_ref, bo_ref,
                         g1_ref, be1_ref,
                         w1_ref, b1_ref, w2_ref, b2_ref,
                         g2_ref, be2_ref,
                         o_ref,
                         act_ref,
                         *, num_head, key_size, value_size):
    l = pl.program_id(1)
    bf16 = jnp.bfloat16
    f32 = jnp.float32

    # Load the batch-b activation into the VMEM carry only on the first layer.
    @pl.when(l == 0)
    def _():
        act_ref[...] = x_ref[0]

    x = act_ref[...]                                  # (S, D) f32
    S, D = x.shape
    H, K, V = num_head, key_size, value_size
    HK = H * K
    HV = H * V

    x_bf = x.astype(bf16)

    # --- Attention ---------------------------------------------------------
    # Single lane-dense QKV projection; 1/sqrt(K) is pre-folded into Wq/bq.
    qkv = jnp.dot(x_bf, wqkv_ref[0],
                  preferred_element_type=f32) + bqkv_ref[0]          # (S, 2HK+HV)

    q = jnp.transpose(qkv[:, :HK].astype(bf16).reshape(S, H, K), (1, 0, 2))       # (H,S,K)
    k = jnp.transpose(qkv[:, HK:2 * HK].astype(bf16).reshape(S, H, K), (1, 0, 2)) # (H,S,K)
    v = jnp.transpose(qkv[:, 2 * HK:].astype(bf16).reshape(S, H, V), (1, 0, 2))   # (H,S,V)

    # TODO(synk): flash-tile this block (KV loop + online softmax) before
    #             scaling S — the (H,S,S) f32 scores exceed VMEM at large S.
    scores = jnp.einsum('hqd,hkd->hqk', q, k,
                        preferred_element_type=f32)                   # (H,S,S) f32
    scores = scores - jnp.max(scores, axis=-1, keepdims=True)
    p = jnp.exp(scores)
    # EUP approximate reciprocal for the softmax denominator (frees the VALU).
    p = p * pl.reciprocal(jnp.sum(p, axis=-1, keepdims=True), approx=True)

    ctx = jnp.einsum('hqk,hkv->hqv', p.astype(bf16), v,
                     preferred_element_type=f32)                      # (H,S,V) f32

    # Output projection with the head reduction fused into the MXU contraction:
    # (S, H*V) @ (H*V, D).
    ctx2 = jnp.transpose(ctx, (1, 0, 2)).reshape(S, HV).astype(bf16)
    attn_out = jnp.dot(ctx2, wo_ref[0],
                       preferred_element_type=f32) + bo_ref[0]        # (S, D) f32

    # Residual + LayerNorm1 (f32).
    y = _layer_norm(x + attn_out, g1_ref[0], be1_ref[0])

    # --- FFN: Linear -> ReLU -> (Dropout: identity in eval) -> Linear ------
    # TODO(synk): tile inner_size / S with an extra grid axis + f32 VMEM
    #             accumulator at production sizes.
    h1 = jnp.dot(y.astype(bf16), w1_ref[0],
                 preferred_element_type=f32) + b1_ref[0]
    h1 = jnp.maximum(h1, 0.0)
    ff = jnp.dot(h1.astype(bf16), w2_ref[0],
                 preferred_element_type=f32) + b2_ref[0]

    # Residual + LayerNorm2.
    z = _layer_norm(ff + y, g2_ref[0], be2_ref[0])

    # Carry the activation to the next layer; emit HBM output only once.
    act_ref[...] = z

    @pl.when(l == pl.num_programs(1) - 1)
    def _():
        o_ref[0] = z.astype(o_ref.dtype)


def _stacked_spec(shape):
    """BlockSpec for a weight stacked over layers: pick layer l each grid step."""
    rest = tuple(shape[1:])
    zeros = (0,) * len(rest)
    return pl.BlockSpec((1,) + rest, lambda b, l, zeros=zeros: (l,) + zeros)


def _vmem_limit_bytes():
    # Generation-aware scoped-VMEM budget (v7x has only 64 MiB per TensorCore).
    try:
        cap = int(pltpu.get_tpu_info().vmem_capacity_bytes)
    except Exception:
        cap = 64 * 1024 * 1024
    return int(min(48 * 1024 * 1024, (cap * 3) // 4))


def transformer_encoder(x, packed_params, num_head, key_size, value_size):
    """Run the full L-layer encoder in a single fused pallas_call."""
    B, S, D = x.shape
    L = packed_params[0].shape[0]

    in_specs = [pl.BlockSpec((1, S, D), lambda b, l: (b, 0, 0))]
    in_specs += [_stacked_spec(p.shape) for p in packed_params]

    kernel = functools.partial(fused_encoder_kernel,
                               num_head=num_head,
                               key_size=key_size,
                               value_size=value_size)

    return pl.pallas_call(
        kernel,
        out_shape=jax.ShapeDtypeStruct((B, S, D), x.dtype),
        grid=(B, L),                       # L innermost: activation carried in VMEM
        in_specs=in_specs,
        out_specs=pl.BlockSpec((1, S, D), lambda b, l: (b, 0, 0)),
        scratch_shapes=[pltpu.VMEM((S, D), jnp.float32)],   # per-core activation carry
        # Output overwrites the input activations in place (one HBM buffer).
        input_output_aliases={0: 0},
        compiler_params=pltpu.CompilerParams(
            dimension_semantics=("parallel", "arbitrary"),  # megacore over batch
            vmem_limit_bytes=_vmem_limit_bytes(),
        ),
    )(x, *packed_params)


# ----------------------------------------------------------------------------
# Parameter construction (raw f32, PyTorch-Linear-transposed layout) + packing
# ----------------------------------------------------------------------------

def init_layer_params(key, model_size, inner_size, key_size, value_size, num_head):
    """Raw f32 layer parameters. W_jax = W_pytorch.T (in_features, out_features)."""
    hk = num_head * key_size
    hv = num_head * value_size

    def lin(k, fan_in, fan_out):
        k1, k2 = jax.random.split(k)
        bound = 1.0 / math.sqrt(fan_in)
        w = jax.random.uniform(k1, (fan_in, fan_out), jnp.float32, -bound, bound)
        b = jax.random.uniform(k2, (fan_out,), jnp.float32, -bound, bound)
        return w, b

    keys = jax.random.split(key, 6)
    wq, bq = lin(keys[0], model_size, hk)
    wk, bk = lin(keys[1], model_size, hk)
    wv, bv = lin(keys[2], model_size, hv)
    wo, bo = lin(keys[3], hv, model_size)
    w1, b1 = lin(keys[4], model_size, inner_size)
    w2, b2 = lin(keys[5], inner_size, model_size)
    g1 = jnp.ones((model_size,), jnp.float32)
    be1 = jnp.zeros((model_size,), jnp.float32)
    g2 = jnp.ones((model_size,), jnp.float32)
    be2 = jnp.zeros((model_size,), jnp.float32)
    return (wq, bq, wk, bk, wv, bv, wo, bo, g1, be1, w1, b1, w2, b2, g2, be2)


def pack_params(raw_layers, key_size):
    """Kernel layout: QKV fused (+1/sqrt(K) folded into Wq/bq), bf16 matmul
    weights, f32 biases / LN affine, everything stacked over a leading L axis."""
    bf16 = jnp.bfloat16
    scale = 1.0 / math.sqrt(key_size)
    per_layer = []
    for p in raw_layers:
        (wq, bq, wk, bk, wv, bv, wo, bo,
         g1, be1, w1, b1, w2, b2, g2, be2) = p
        w_qkv = jnp.concatenate([wq * scale, wk, wv], axis=1).astype(bf16)  # (D, 2HK+HV)
        b_qkv = jnp.concatenate([bq * scale, bk, bv]).reshape(1, -1)        # f32
        per_layer.append([
            w_qkv, b_qkv,
            wo.astype(bf16), bo.reshape(1, -1),
            g1.reshape(1, -1), be1.reshape(1, -1),
            w1.astype(bf16), b1.reshape(1, -1),
            w2.astype(bf16), b2.reshape(1, -1),
            g2.reshape(1, -1), be2.reshape(1, -1),
        ])
    return [jnp.stack(ps, axis=0) for ps in zip(*per_layer)]


# ----------------------------------------------------------------------------
# Pure-JAX f32 reference (same math as the PyTorch module, exact softmax).
# ----------------------------------------------------------------------------

def reference_encoder(x, raw_layers, num_head, key_size, value_size):
    def ln(y, g, b, eps=1e-6):
        m = jnp.mean(y, -1, keepdims=True)
        v = jnp.mean((y - m) ** 2, -1, keepdims=True)
        return (y - m) * jax.lax.rsqrt(v + eps) * g + b

    out = x
    for p in raw_layers:
        (wq, bq, wk, bk, wv, bv, wo, bo,
         g1, be1, w1, b1, w2, b2, g2, be2) = p
        B, S, D = out.shape
        q = (out @ wq + bq).reshape(B, S, num_head, key_size)
        k = (out @ wk + bk).reshape(B, S, num_head, key_size)
        v = (out @ wv + bv).reshape(B, S, num_head, value_size)
        s = jnp.einsum('bqhk,bshk->bhqs', q, k) / math.sqrt(key_size)
        a = jax.nn.softmax(s, axis=-1)
        ctx = jnp.einsum('bhqs,bshv->bqhv', a, v).reshape(B, S, num_head * value_size)
        attn = ctx @ wo + bo
        y = ln(out + attn, g1, be1)
        h1 = jax.nn.relu(y @ w1 + b1)
        ff = h1 @ w2 + b2
        out = ln(ff + y, g2, be2)
    return out


if __name__ == "__main__":
    # Small but lane-dense config: D = H*K = H*V = 128, inner = 256.
    num_layers = 2
    batch, seq = 2, 8
    model_size, inner_size = 128, 256
    key_size, value_size, num_head = 32, 32, 4

    root = jax.random.PRNGKey(0)
    x_key, *layer_keys = jax.random.split(root, num_layers + 1)

    x = jax.random.normal(x_key, (batch, seq, model_size), jnp.float32)
    raw = [init_layer_params(layer_keys[i], model_size, inner_size,
                             key_size, value_size, num_head)
           for i in range(num_layers)]

    # Compute the reference first: the kernel aliases its input buffer.
    ref = jax.block_until_ready(
        reference_encoder(x, raw, num_head, key_size, value_size))

    packed = pack_params(raw, key_size)
    out = transformer_encoder(x, packed, num_head, key_size, value_size)
    out = jax.block_until_ready(out)

    assert out.shape == (batch, seq, model_size)
    assert bool(jnp.all(jnp.isfinite(out)))
    max_err = float(jnp.max(jnp.abs(out - ref)))
    # bf16 matmul operands + approximate softmax reciprocal vs f32 reference.
    assert max_err < 0.3, f"kernel/reference mismatch: max abs err {max_err}"
    print("KERNEL_OK")
</pallas_src>

<mosaic_0001>
module attributes {stable_mosaic.version = 11 : i64} {
  func.func @fused_encoder_kernel(%arg0: i32, %arg1: i32, %arg2: memref<1x8x128xf32, #tpu.memory_space<vmem>>, %arg3: memref<1x128x384xbf16, #tpu.memory_space<vmem>>, %arg4: memref<1x1x384xf32, #tpu.memory_space<vmem>>, %arg5: memref<1x128x128xbf16, #tpu.memory_space<vmem>>, %arg6: memref<1x1x128xf32, #tpu.memory_space<vmem>>, %arg7: memref<1x1x128xf32, #tpu.memory_space<vmem>>, %arg8: memref<1x1x128xf32, #tpu.memory_space<vmem>>, %arg9: memref<1x128x256xbf16, #tpu.memory_space<vmem>>, %arg10: memref<1x1x256xf32, #tpu.memory_space<vmem>>, %arg11: memref<1x256x128xbf16, #tpu.memory_space<vmem>>, %arg12: memref<1x1x128xf32, #tpu.memory_space<vmem>>, %arg13: memref<1x1x128xf32, #tpu.memory_space<vmem>>, %arg14: memref<1x1x128xf32, #tpu.memory_space<vmem>>, %arg15: memref<1x8x128xf32, #tpu.memory_space<vmem>>, %arg16: memref<8x128xf32, #tpu.memory_space<vmem>>) attributes {dimension_semantics = [#tpu.dimension_semantics<parallel>, #tpu.dimension_semantics<arbitrary>], iteration_bounds = array<i64: 2, 2>, scalar_prefetch = 0 : i64, scratch_operands = 1 : i64, tpu.core_type = #tpu.core_type<tc>, window_params = [{transform_indices = @transform_0, window_bounds = array<i64: 1, 8, 128>}, {transform_indices = @transform_1, window_bounds = array<i64: 1, 128, 384>}, {transform_indices = @transform_2, window_bounds = array<i64: 1, 1, 384>}, {transform_indices = @transform_3, window_bounds = array<i64: 1, 128, 128>}, {transform_indices = @transform_4, window_bounds = array<i64: 1, 1, 128>}, {transform_indices = @transform_5, window_bounds = array<i64: 1, 1, 128>}, {transform_indices = @transform_6, window_bounds = array<i64: 1, 1, 128>}, {transform_indices = @transform_7, window_bounds = array<i64: 1, 128, 256>}, {transform_indices = @transform_8, window_bounds = array<i64: 1, 1, 256>}, {transform_indices = @transform_9, window_bounds = array<i64: 1, 256, 128>}, {transform_indices = @transform_10, window_bounds = array<i64: 1, 1, 128>}, {transform_indices = @transform_11, window_bounds = array<i64: 1, 1, 128>}, {transform_indices = @transform_12, window_bounds = array<i64: 1, 1, 128>}, {transform_indices = @transform_13, window_bounds = array<i64: 1, 8, 128>}]} {
    %c0_i32 = arith.constant 0 : i32
    %0 = arith.cmpi eq, %arg1, %c0_i32 : i32
    %1 = arith.extui %0 : i1 to i32
    %c0_i32_0 = arith.constant 0 : i32
    %2 = arith.cmpi ne, %1, %c0_i32_0 : i32
    scf.if %2 {
      %c0_59 = arith.constant 0 : index
      %c0_60 = arith.constant 0 : index
      %c0_61 = arith.constant 0 : index
      %123 = vector.load %arg2[%c0_59, %c0_60, %c0_61] : memref<1x8x128xf32, #tpu.memory_space<vmem>>, vector<1x8x128xf32>
      %124 = vector.shape_cast %123 : vector<1x8x128xf32> to vector<8x128xf32>
      %c0_62 = arith.constant 0 : index
      %c0_63 = arith.constant 0 : index
      %125 = vector.load %arg16[%c0_62, %c0_63] : memref<8x128xf32, #tpu.memory_space<vmem>>, vector<8x128xf32>
      tpu.vector_store %arg16[%c0_62, %c0_63], %124 {strides = array<i32>} : memref<8x128xf32, #tpu.memory_space<vmem>>, vector<8x128xf32>,
    } else {
    }
    %c0 = arith.constant 0 : index
    %c0_1 = arith.constant 0 : index
    %3 = vector.load %arg16[%c0, %c0_1] : memref<8x128xf32, #tpu.memory_space<vmem>>, vector<8x128xf32>
    %4 = arith.truncf %3 : vector<8x128xf32> to vector<8x128xbf16>
    %c0_2 = arith.constant 0 : index
    %c0_3 = arith.constant 0 : index
    %c0_4 = arith.constant 0 : index
    %5 = vector.load %arg3[%c0_2, %c0_3, %c0_4] : memref<1x128x384xbf16, #tpu.memory_space<vmem>>, vector<1x128x384xbf16>
    %6 = vector.shape_cast %5 : vector<1x128x384xbf16> to vector<128x384xbf16>
    %cst = arith.constant dense<0.000000e+00> : vector<8x384xf32>
    %7 = tpu.matmul %4, %6, %cst {dimension_numbers = #tpu.dot_dimension_numbers<[1], [0], [0], [1], [0, 0, 1, 1], [], []>} : vector<8x128xbf16>, vector<128x384xbf16>, vector<8x384xf32> -> vector<8x384xf32>
    %c0_5 = arith.constant 0 : index
    %c0_6 = arith.constant 0 : index
    %c0_7 = arith.constant 0 : index
    %8 = vector.load %arg4[%c0_5, %c0_6, %c0_7] : memref<1x1x384xf32, #tpu.memory_space<vmem>>, vector<1x1x384xf32>
    %9 = vector.shape_cast %8 : vector<1x1x384xf32> to vector<1x384xf32>
    %10 = vector.broadcast %9 : vector<1x384xf32> to vector<8x384xf32>
    %11 = arith.addf %7, %10 : vector<8x384xf32>
    %12 = vector.extract_strided_slice %11 {offsets = [0, 0], sizes = [8, 128], strides = [1, 1]} : vector<8x384xf32> to vector<8x128xf32>
    %13 = arith.truncf %12 : vector<8x128xf32> to vector<8x128xbf16>
    %14 = vector.shape_cast %13 : vector<8x128xbf16> to vector<8x4x32xbf16>
    %15 = tpu.transpose %14, [1, 0, 2] : vector<8x4x32xbf16> -> vector<4x8x32xbf16>
    %16 = vector.extract_strided_slice %11 {offsets = [0, 128], sizes = [8, 128], strides = [1, 1]} : vector<8x384xf32> to vector<8x128xf32>
    %17 = arith.truncf %16 : vector<8x128xf32> to vector<8x128xbf16>
    %18 = vector.shape_cast %17 : vector<8x128xbf16> to vector<8x4x32xbf16>
    %19 = tpu.transpose %18, [1, 0, 2] : vector<8x4x32xbf16> -> vector<4x8x32xbf16>
    %20 = vector.extract_strided_slice %11 {offsets = [0, 256], sizes = [8, 128], strides = [1, 1]} : vector<8x384xf32> to vector<8x128xf32>
    %21 = arith.truncf %20 : vector<8x128xf32> to vector<8x128xbf16>
    %22 = vector.shape_cast %21 : vector<8x128xbf16> to vector<8x4x32xbf16>
    %23 = tpu.transpose %22, [1, 0, 2] : vector<8x4x32xbf16> -> vector<4x8x32xbf16>
    "tpu.trace_start"() <{level = 10 : i32, message = "hqd,hkd->hqk"}> : () -> ()
    %cst_8 = arith.constant dense<0.000000e+00> : vector<4x8x8xf32>
    %24 = tpu.matmul %15, %19, %cst_8 {dimension_numbers = #tpu.dot_dimension_numbers<[2], [2], [1], [1], [0, 0, 0, 1, 1, 1], [0], [0]>} : vector<4x8x32xbf16>, vector<4x8x32xbf16>, vector<4x8x8xf32> -> vector<4x8x8xf32>
    "tpu.trace_stop"() : () -> ()
    %cst_9 = arith.constant dense<0xFF800000> : vector<4x8xf32>
    %25 = vector.multi_reduction <maximumf>, %24, %cst_9 [2] : vector<4x8x8xf32> to vector<4x8xf32>
    %26 = vector.shape_cast %25 : vector<4x8xf32> to vector<4x8x1xf32>
    %27 = vector.broadcast %26 : vector<4x8x1xf32> to vector<4x8x8xf32>
    %28 = arith.subf %24, %27 : vector<4x8x8xf32>
    %29 = math.exp %28 : vector<4x8x8xf32>
    %cst_10 = arith.constant dense<0.000000e+00> : vector<4x8xf32>
    %30 = vector.multi_reduction <add>, %29, %cst_10 [2] : vector<4x8x8xf32> to vector<4x8xf32>
    %31 = vector.shape_cast %30 : vector<4x8xf32> to vector<4x8x1xf32>
    %32 = tpu.reciprocal %31 {approx = true} : vector<4x8x1xf32> -> vector<4x8x1xf32>
    %33 = vector.broadcast %32 : vector<4x8x1xf32> to vector<4x8x8xf32>
    %34 = arith.mulf %29, %33 : vector<4x8x8xf32>
    %35 = arith.truncf %34 : vector<4x8x8xf32> to vector<4x8x8xbf16>
    "tpu.trace_start"() <{level = 10 : i32, message = "hqk,hkv->hqv"}> : () -> ()
    %cst_11 = arith.constant dense<0.000000e+00> : vector<4x8x32xf32>
    %36 = tpu.matmul %35, %23, %cst_11 {dimension_numbers = #tpu.dot_dimension_numbers<[2], [1], [1], [2], [0, 0, 0, 1, 1, 2], [0], [0]>} : vector<4x8x8xbf16>, vector<4x8x32xbf16>, vector<4x8x32xf32> -> vector<4x8x32xf32>
    "tpu.trace_stop"() : () -> ()
    %37 = tpu.transpose %36, [1, 0, 2] : vector<4x8x32xf32> -> vector<8x4x32xf32>
    %38 = vector.shape_cast %37 : vector<8x4x32xf32> to vector<8x128xf32>
    %39 = arith.truncf %38 : vector<8x128xf32> to vector<8x128xbf16>
    %c0_12 = arith.constant 0 : index
    %c0_13 = arith.constant 0 : index
    %c0_14 = arith.constant 0 : index
    %40 = vector.load %arg5[%c0_12, %c0_13, %c0_14] : memref<1x128x128xbf16, #tpu.memory_space<vmem>>, vector<1x128x128xbf16>
    %41 = vector.shape_cast %40 : vector<1x128x128xbf16> to vector<128x128xbf16>
    %cst_15 = arith.constant dense<0.000000e+00> : vector<8x128xf32>
    %42 = tpu.matmul %39, %41, %cst_15 {dimension_numbers = #tpu.dot_dimension_numbers<[1], [0], [0], [1], [0, 0, 1, 1], [], []>} : vector<8x128xbf16>, vector<128x128xbf16>, vector<8x128xf32> -> vector<8x128xf32>
    %c0_16 = arith.constant 0 : index
    %c0_17 = arith.constant 0 : index
    %c0_18 = arith.constant 0 : index
    %43 = vector.load %arg6[%c0_16, %c0_17, %c0_18] : memref<1x1x128xf32, #tpu.memory_space<vmem>>, vector<1x1x128xf32>
    %44 = vector.shape_cast %43 : vector<1x1x128xf32> to vector<1x128xf32>
    %45 = vector.broadcast %44 : vector<1x128xf32> to vector<8x128xf32>
    %46 = arith.addf %42, %45 : vector<8x128xf32>
    %47 = arith.addf %3, %46 : vector<8x128xf32>
    %c0_19 = arith.constant 0 : index
    %c0_20 = arith.constant 0 : index
    %c0_21 = arith.constant 0 : index
    %48 = vector.load %arg7[%c0_19, %c0_20, %c0_21] : memref<1x1x128xf32, #tpu.memory_space<vmem>>, vector<1x1x128xf32>
    %49 = vector.shape_cast %48 : vector<1x1x128xf32> to vector<1x128xf32>
    %c0_22 = arith.constant 0 : index
    %c0_23 = arith.constant 0 : index
    %c0_24 = arith.constant 0 : index
    %50 = vector.load %arg8[%c0_22, %c0_23, %c0_24] : memref<1x1x128xf32, #tpu.memory_space<vmem>>, vector<1x1x128xf32>
    %51 = vector.shape_cast %50 : vector<1x1x128xf32> to vector<1x128xf32>
    %cst_25 = arith.constant dense<0.000000e+00> : vector<8xf32>
    %52 = vector.multi_reduction <add>, %47, %cst_25 [1] : vector<8x128xf32> to vector<8xf32>
    %53 = vector.shape_cast %52 : vector<8xf32> to vector<8x1xf32>
    %cst_26 = arith.constant 1.280000e+02 : f32
    %54 = vector.broadcast %cst_26 : f32 to vector<8x1xf32>
    %55 = arith.divf %53, %54 : vector<8x1xf32>
    %56 = vector.broadcast %55 : vector<8x1xf32> to vector<8x128xf32>
    %57 = arith.subf %47, %56 : vector<8x128xf32>
    %58 = arith.mulf %57, %57 : vector<8x128xf32>
    %cst_27 = arith.constant dense<0.000000e+00> : vector<8xf32>
    %59 = vector.multi_reduction <add>, %58, %cst_27 [1] : vector<8x128xf32> to vector<8xf32>
    %60 = vector.shape_cast %59 : vector<8xf32> to vector<8x1xf32>
    %cst_28 = arith.constant 1.280000e+02 : f32
    %61 = vector.broadcast %cst_28 : f32 to vector<8x1xf32>
    %62 = arith.divf %60, %61 : vector<8x1xf32>
    %63 = vector.broadcast %55 : vector<8x1xf32> to vector<8x128xf32>
    %64 = arith.subf %47, %63 : vector<8x128xf32>
    %cst_29 = arith.constant 9.99999997E-7 : f32
    %65 = vector.broadcast %cst_29 : f32 to vector<8x1xf32>
    %66 = arith.addf %62, %65 : vector<8x1xf32>
    %67 = math.rsqrt %66 : vector<8x1xf32>
    %68 = vector.broadcast %67 : vector<8x1xf32> to vector<8x128xf32>
    %69 = arith.mulf %64, %68 : vector<8x128xf32>
    %70 = vector.broadcast %49 : vector<1x128xf32> to vector<8x128xf32>
    %71 = arith.mulf %69, %70 : vector<8x128xf32>
    %72 = vector.broadcast %51 : vector<1x128xf32> to vector<8x128xf32>
    %73 = arith.addf %71, %72 : vector<8x128xf32>
    %74 = arith.truncf %73 : vector<8x128xf32> to vector<8x128xbf16>
    %c0_30 = arith.constant 0 : index
    %c0_31 = arith.constant 0 : index
    %c0_32 = arith.constant 0 : index
    %75 = vector.load %arg9[%c0_30, %c0_31, %c0_32] : memref<1x128x256xbf16, #tpu.memory_space<vmem>>, vector<1x128x256xbf16>
    %76 = vector.shape_cast %75 : vector<1x128x256xbf16> to vector<128x256xbf16>
    %cst_33 = arith.constant dense<0.000000e+00> : vector<8x256xf32>
    %77 = tpu.matmul %74, %76, %cst_33 {dimension_numbers = #tpu.dot_dimension_numbers<[1], [0], [0], [1], [0, 0, 1, 1], [], []>} : vector<8x128xbf16>, vector<128x256xbf16>, vector<8x256xf32> -> vector<8x256xf32>
    %c0_34 = arith.constant 0 : index
    %c0_35 = arith.constant 0 : index
    %c0_36 = arith.constant 0 : index
    %78 = vector.load %arg10[%c0_34, %c0_35, %c0_36] : memref<1x1x256xf32, #tpu.memory_space<vmem>>, vector<1x1x256xf32>
    %79 = vector.shape_cast %78 : vector<1x1x256xf32> to vector<1x256xf32>
    %80 = vector.broadcast %79 : vector<1x256xf32> to vector<8x256xf32>
    %81 = arith.addf %77, %80 : vector<8x256xf32>
    %cst_37 = arith.constant 0.000000e+00 : f32
    %82 = vector.broadcast %cst_37 : f32 to vector<8x256xf32>
    %83 = arith.maximumf %81, %82 : vector<8x256xf32>
    %84 = arith.truncf %83 : vector<8x256xf32> to vector<8x256xbf16>
    %c0_38 = arith.constant 0 : index
    %c0_39 = arith.constant 0 : index
    %c0_40 = arith.constant 0 : index
    %85 = vector.load %arg11[%c0_38, %c0_39, %c0_40] : memref<1x256x128xbf16, #tpu.memory_space<vmem>>, vector<1x256x128xbf16>
    %86 = vector.shape_cast %85 : vector<1x256x128xbf16> to vector<256x128xbf16>
    %cst_41 = arith.constant dense<0.000000e+00> : vector<8x128xf32>
    %87 = tpu.matmul %84, %86, %cst_41 {dimension_numbers = #tpu.dot_dimension_numbers<[1], [0], [0], [1], [0, 0, 1, 1], [], []>} : vector<8x256xbf16>, vector<256x128xbf16>, vector<8x128xf32> -> vector<8x128xf32>
    %c0_42 = arith.constant 0 : index
    %c0_43 = arith.constant 0 : index
    %c0_44 = arith.constant 0 : index
    %88 = vector.load %arg12[%c0_42, %c0_43, %c0_44] : memref<1x1x128xf32, #tpu.memory_space<vmem>>, vector<1x1x128xf32>
    %89 = vector.shape_cast %88 : vector<1x1x128xf32> to vector<1x128xf32>
    %90 = vector.broadcast %89 : vector<1x128xf32> to vector<8x128xf32>
    %91 = arith.addf %87, %90 : vector<8x128xf32>
    %92 = arith.addf %91, %73 : vector<8x128xf32>
    %c0_45 = arith.constant 0 : index
    %c0_46 = arith.constant 0 : index
    %c0_47 = arith.constant 0 : index
    %93 = vector.load %arg13[%c0_45, %c0_46, %c0_47] : memref<1x1x128xf32, #tpu.memory_space<vmem>>, vector<1x1x128xf32>
    %94 = vector.shape_cast %93 : vector<1x1x128xf32> to vector<1x128xf32>
    %c0_48 = arith.constant 0 : index
    %c0_49 = arith.constant 0 : index
    %c0_50 = arith.constant 0 : index
    %95 = vector.load %arg14[%c0_48, %c0_49, %c0_50] : memref<1x1x128xf32, #tpu.memory_space<vmem>>, vector<1x1x128xf32>
    %96 = vector.shape_cast %95 : vector<1x1x128xf32> to vector<1x128xf32>
    %cst_51 = arith.constant dense<0.000000e+00> : vector<8xf32>
    %97 = vector.multi_reduction <add>, %92, %cst_51 [1] : vector<8x128xf32> to vector<8xf32>
    %98 = vector.shape_cast %97 : vector<8xf32> to vector<8x1xf32>
    %cst_52 = arith.constant 1.280000e+02 : f32
    %99 = vector.broadcast %cst_52 : f32 to vector<8x1xf32>
    %100 = arith.divf %98, %99 : vector<8x1xf32>
    %101 = vector.broadcast %100 : vector<8x1xf32> to vector<8x128xf32>
    %102 = arith.subf %92, %101 : vector<8x128xf32>
    %103 = arith.mulf %102, %102 : vector<8x128xf32>
    %cst_53 = arith.constant dense<0.000000e+00> : vector<8xf32>
    %104 = vector.multi_reduction <add>, %103, %cst_53 [1] : vector<8x128xf32> to vector<8xf32>
    %105 = vector.shape_cast %104 : vector<8xf32> to vector<8x1xf32>
    %cst_54 = arith.constant 1.280000e+02 : f32
    %106 = vector.broadcast %cst_54 : f32 to vector<8x1xf32>
    %107 = arith.divf %105, %106 : vector<8x1xf32>
    %108 = vector.broadcast %100 : vector<8x1xf32> to vector<8x128xf32>
    %109 = arith.subf %92, %108 : vector<8x128xf32>
    %cst_55 = arith.constant 9.99999997E-7 : f32
    %110 = vector.broadcast %cst_55 : f32 to vector<8x1xf32>
    %111 = arith.addf %107, %110 : vector<8x1xf32>
    %112 = math.rsqrt %111 : vector<8x1xf32>
    %113 = vector.broadcast %112 : vector<8x1xf32> to vector<8x128xf32>
    %114 = arith.mulf %109, %113 : vector<8x128xf32>
    %115 = vector.broadcast %94 : vector<1x128xf32> to vector<8x128xf32>
    %116 = arith.mulf %114, %115 : vector<8x128xf32>
    %117 = vector.broadcast %96 : vector<1x128xf32> to vector<8x128xf32>
    %118 = arith.addf %116, %117 : vector<8x128xf32>
    %c0_56 = arith.constant 0 : index
    %c0_57 = arith.constant 0 : index
    %119 = vector.load %arg16[%c0_56, %c0_57] : memref<8x128xf32, #tpu.memory_space<vmem>>, vector<8x128xf32>
    tpu.vector_store %arg16[%c0_56, %c0_57], %118 {strides = array<i32>} : memref<8x128xf32, #tpu.memory_space<vmem>>, vector<8x128xf32>,
    %c1_i32 = arith.constant 1 : i32
    %120 = arith.cmpi eq, %arg1, %c1_i32 : i32
    %121 = arith.extui %120 : i1 to i32
    %c0_i32_58 = arith.constant 0 : i32
    %122 = arith.cmpi ne, %121, %c0_i32_58 : i32
    scf.if %122 {
      %c0_59 = arith.constant 0 : index
      %c0_60 = arith.constant 0 : index
      %c0_61 = arith.constant 0 : index
      %123 = vector.load %arg15[%c0_59, %c0_60, %c0_61] : memref<1x8x128xf32, #tpu.memory_space<vmem>>, vector<1x8x128xf32>
      %124 = vector.shape_cast %123 : vector<1x8x128xf32> to vector<8x128xf32>
      %125 = vector.shape_cast %118 : vector<8x128xf32> to vector<1x8x128xf32>
      tpu.vector_store %arg15[%c0_59, %c0_60, %c0_61], %125 {strides = array<i32>} : memref<1x8x128xf32, #tpu.memory_space<vmem>>, vector<1x8x128xf32>,
    } else {
    }
    return
  }
  func.func @transform_0(%arg0: i32, %arg1: i32) -> (i32, i32, i32) {
    %c0_i32 = arith.constant 0 : i32
    %c0_i32_0 = arith.constant 0 : i32
    %c0_i32_1 = arith.constant 0 : i32
    return %arg0, %c0_i32, %c0_i32_0 : i32, i32, i32
  }
  func.func @transform_1(%arg0: i32, %arg1: i32) -> (i32, i32, i32) {
    %c0_i32 = arith.constant 0 : i32
    %c0_i32_0 = arith.constant 0 : i32
    %c0_i32_1 = arith.constant 0 : i32
    return %arg1, %c0_i32, %c0_i32_0 : i32, i32, i32
  }
  func.func @transform_2(%arg0: i32, %arg1: i32) -> (i32, i32, i32) {
    %c0_i32 = arith.constant 0 : i32
    %c0_i32_0 = arith.constant 0 : i32
    %c0_i32_1 = arith.constant 0 : i32
    return %arg1, %c0_i32, %c0_i32_0 : i32, i32, i32
  }
  func.func @transform_3(%arg0: i32, %arg1: i32) -> (i32, i32, i32) {
    %c0_i32 = arith.constant 0 : i32
    %c0_i32_0 = arith.constant 0 : i32
    %c0_i32_1 = arith.constant 0 : i32
    return %arg1, %c0_i32, %c0_i32_0 : i32, i32, i32
  }
  func.func @transform_4(%arg0: i32, %arg1: i32) -> (i32, i32, i32) {
    %c0_i32 = arith.constant 0 : i32
    %c0_i32_0 = arith.constant 0 : i32
    %c0_i32_1 = arith.constant 0 : i32
    return %arg1, %c0_i32, %c0_i32_0 : i32, i32, i32
  }
  func.func @transform_5(%arg0: i32, %arg1: i32) -> (i32, i32, i32) {
    %c0_i32 = arith.constant 0 : i32
    %c0_i32_0 = arith.constant 0 : i32
    %c0_i32_1 = arith.constant 0 : i32
    return %arg1, %c0_i32, %c0_i32_0 : i32, i32, i32
  }
  func.func @transform_6(%arg0: i32, %arg1: i32) -> (i32, i32, i32) {
    %c0_i32 = arith.constant 0 : i32
    %c0_i32_0 = arith.constant 0 : i32
    %c0_i32_1 = arith.constant 0 : i32
    return %arg1, %c0_i32, %c0_i32_0 : i32, i32, i32
  }
  func.func @transform_7(%arg0: i32, %arg1: i32) -> (i32, i32, i32) {
    %c0_i32 = arith.constant 0 : i32
    %c0_i32_0 = arith.constant 0 : i32
    %c0_i32_1 = arith.constant 0 : i32
    return %arg1, %c0_i32, %c0_i32_0 : i32, i32, i32
  }
  func.func @transform_8(%arg0: i32, %arg1: i32) -> (i32, i32, i32) {
    %c0_i32 = arith.constant 0 : i32
    %c0_i32_0 = arith.constant 0 : i32
    %c0_i32_1 = arith.constant 0 : i32
    return %arg1, %c0_i32, %c0_i32_0 : i32, i32, i32
  }
  func.func @transform_9(%arg0: i32, %arg1: i32) -> (i32, i32, i32) {
    %c0_i32 = arith.constant 0 : i32
    %c0_i32_0 = arith.constant 0 : i32
    %c0_i32_1 = arith.constant 0 : i32
    return %arg1, %c0_i32, %c0_i32_0 : i32, i32, i32
  }
  func.func @transform_10(%arg0: i32, %arg1: i32) -> (i32, i32, i32) {
    %c0_i32 = arith.constant 0 : i32
    %c0_i32_0 = arith.constant 0 : i32
    %c0_i32_1 = arith.constant 0 : i32
    return %arg1, %c0_i32, %c0_i32_0 : i32, i32, i32
  }
  func.func @transform_11(%arg0: i32, %arg1: i32) -> (i32, i32, i32) {
    %c0_i32 = arith.constant 0 : i32
    %c0_i32_0 = arith.constant 0 : i32
    %c0_i32_1 = arith.constant 0 : i32
    return %arg1, %c0_i32, %c0_i32_0 : i32, i32, i32
  }
  func.func @transform_12(%arg0: i32, %arg1: i32) -> (i32, i32, i32) {
    %c0_i32 = arith.constant 0 : i32
    %c0_i32_0 = arith.constant 0 : i32
    %c0_i32_1 = arith.constant 0 : i32
    return %arg1, %c0_i32, %c0_i32_0 : i32, i32, i32
  }
  func.func @transform_13(%arg0: i32, %arg1: i32) -> (i32, i32, i32) {
    %c0_i32 = arith.constant 0 : i32
    %c0_i32_0 = arith.constant 0 : i32
    %c0_i32_1 = arith.constant 0 : i32
    return %arg0, %c0_i32, %c0_i32_0 : i32, i32, i32
  }
}

</mosaic_0001>

<bundles_post_ra>
// kernel: tpu_custom_call.1
= control target key start
LH: loop header
LB: loop body
LE: loop exit
PB: predicated region body
PF: predicated region fallthrough
CT: control target
= control target key end

     0   :  { %s3946_s0 = inlined_call_operand.hbm [shape: f32[2,8,128], index: 0, kind: input, shape index: {}, may-alias: {0,13}]   ;;  %s3947_s1 = inlined_call_operand.hbm [shape: bf16[2,128,384], index: 1, kind: input, shape index: {}]   ;;  %s3948_s2 = inlined_call_operand.vmem [shape: f32[2,1,384], index: 2, kind: input, shape index: {}]   ;;  %s3949_s3 = inlined_call_operand.hbm [shape: bf16[2,128,128], index: 3, kind: input, shape index: {}]   ;;  %s3950_s4 = inlined_call_operand.vmem [shape: f32[2,1,128], index: 4, kind: input, shape index: {}]   ;;  %s3951_s5 = inlined_call_operand.vmem [shape: f32[2,1,128], index: 5, kind: input, shape index: {}]   ;;  %s3952_s6 = inlined_call_operand.vmem [shape: f32[2,1,128], index: 6, kind: input, shape index: {}]   ;;  %s3953_s7 = inlined_call_operand.hbm [shape: bf16[2,128,256], index: 7, kind: input, shape index: {}]   ;;  %s3954_s8 = inlined_call_operand.vmem [shape: f32[2,1,256], index: 8, kind: input, shape index: {}]   ;;  %s3955_s9 = inlined_call_operand.hbm [shape: bf16[2,256,128], index: 9, kind: input, shape index: {}]   ;;  %s3956_s10 = inlined_call_operand.vmem [shape: f32[2,1,128], index: 10, kind: input, shape index: {}]   ;;  %s3957_s11 = inlined_call_operand.vmem [shape: f32[2,1,128], index: 11, kind: input, shape index: {}]   ;;  %s3958_s12 = inlined_call_operand.vmem [shape: f32[2,1,128], index: 12, kind: input, shape index: {}]   ;;  %s3959_s13 = inlined_call_operand.hbm [shape: f32[2,8,128], index: 13, kind: output, shape index: {}, may-alias: {0,13}]  }
   0x1   :  { %3977 = sst [smem:[#allocation33_spill]] %s3946_s0 }
   0x2   :  { %3978 = sst [smem:[#allocation34_spill]] %s3947_s1 }
   0x3   :  { %3979 = sst [smem:[#allocation35_spill]] %s3948_s2 }
   0x4   :  { %3980 = sst [smem:[#allocation36_spill]] %s3949_s3 }
   0x5   :  { %3981 = sst [smem:[#allocation37_spill]] %s3950_s4 }
   0x6   :  { %3982 = sst [smem:[#allocation38_spill]] %s3951_s5 }
   0x7   :  { %3983 = sst [smem:[#allocation39_spill]] %s3952_s6 }
   0x8   :  { %3984 = sst [smem:[#allocation40_spill]] %s3953_s7 }
   0x9   :  { %3985 = sst [smem:[#allocation41_spill]] %s3954_s8 }
   0xa   :  { %3986 = sst [smem:[#allocation42_spill]] %s3955_s9 }
   0xb   :  { %3987 = sst [smem:[#allocation43_spill]] %s3956_s10 }
   0xc   :  { %3988 = sst [smem:[#allocation44_spill]] %s3957_s11 }
   0xd   :  { %3989 = sst [smem:[#allocation45_spill]] %s3958_s12 }
   0xe   :  { %3990 = sst [smem:[#allocation46_spill]] %s3959_s13 }
   0xf   :  { %18 = vsyncpa [#allocation4], 0 }
  0x10   :  { %20 = vsyncpa [#allocation4 + $0x1], 0 }
  0x11   :  { %21 = vsyncpa [#allocation7], 0 }
  0x12   :  { %23 = vsyncpa [#allocation7 + $0x1], 0 }
  0x13   :  { %24 = vsyncpa [#allocation10], 0 }
  0x14   :  { %26 = vsyncpa [#allocation10 + $0x1], 0 }
  0x15   :  { %27 = vsyncpa [#allocation5], 0 }
  0x16   :  { %29 = vsyncpa [#allocation5 + $0x1], 0  ;;  %s3263_s25 = smov 0   ;;  %s3265_s26 = smov 0  }
  0x17   :  { %s3267_s27 = smov 0   ;;  %s3269_s28 = smov 0  }
  0x18   :  { %s3271_s29 = smov 0   ;;  %s3273_s30 = smov 0  }
  0x19   :  { %s3275_s14 = smov 0   ;;  %s3277_s15 = smov 0  }
  0x1a   :  { %s3279_s16 = smov 0   ;;  %s3281_s17 = smov 0  }
  0x1b   :  { %s3283_s18 = smov 0  }
  0x1c LB: > { %3991 = sst [smem:[#allocation17_spill]] %s3143_s26  ;;  %p62_p0 = scmp.eq.s32.totalorder %s3179_s18, 0  ;;  %s3179_s18 = sphi %s3283_s18, %s35_s18   ;;  %s3175_s17 = sphi %s3281_s17, %s4055_s17   ;;  %s3171_s16 = sphi %s3279_s16, %s4054_s16   ;;  %s3167_s15 = sphi %s3277_s15, %s4053_s15   ;;  %s3163_s14 = sphi %s3275_s14, %s4052_s14   ;;  %s3159_s30 = sphi %s3273_s30, %s4051_s30   ;;  %s3155_s29 = sphi %s3271_s29, %s4050_s29   ;;  %s3151_s28 = sphi %s3269_s28, %s4049_s28   ;;  %s3147_s27 = sphi %s3267_s27, %s4048_s27   ;;  %s3143_s26 = sphi %s3265_s26, %s4047_s26   ;;  %s3139_s25 = sphi %s3263_s25, %s4046_s25  }
  0x1d   : > { %3992 = sst [smem:[#allocation18_spill]] %s3147_s27  ;;  %p87_p1 = scmp.ne.s32.totalorder %s3147_s27, %s3143_s26 }
  0x1e   : > { %3993 = sst [smem:[#allocation19_spill]] %s3151_s28  ;;  %p2769_p2 = scmp.lt.s32.totalorder %s3179_s18, 4 }
  0x1f   : > { %3994 = sst [smem:[#allocation20_spill]] %s3155_s29  ;;  %s448_s20 = sand.u32 1, %s3179_s18  }
  0x20   : > { %3995 = sst [smem:[#allocation21_spill]] %s3159_s30  ;;  %p89_p3 = por %p87_p1, %p62_p0 }
  0x21   : > { %3996 = sst [smem:[#allocation22_spill]] %s3163_s14  ;;  %s3327_s21 = sand.u32 1, %s3147_s27  }
  0x22   : > { %3997 = sst [smem:[#allocation23_spill]] %s3167_s15  ;;  %s2734_s22 = smul.u32 192, %s3171_s16 }
  0x23   : > { %3998 = sst [smem:[#allocation24_spill]] %s3171_s16  ;;  %s2733_s23 = smul.u32 192, %s3327_s21 }
  0x24   : > { %3999 = sst [smem:[#allocation25_spill]] %s3175_s17  ;;  %p3333_p4 = pnand %p2769_p2, %p89_p3 }
  0x25   : > { %4000 = sst [smem:[#allocation26_spill]] %s3179_s18  ;;  %s452_s11 = scalar_lea.vmem [#allocation6], %s2733_s23 }
  0x26   : > { %s4002_s1 = sld [smem:[#allocation34_spill]]  ;;  %s460_s10 = sshll.u32 %s452_s11, 4  ;;  %s461_s10 = int_to_ptr.vmem [resolvable:$true] %s460_s10 }
  0x27   : > { %p2389_p5 = scmp.ge.s32.totalorder %s3179_s18, 1  ;;  %s3341_s8 = scalar_lea.sflag [#allocation7], %s448_s20 }
  0x28   : > { %s3181_s2 = smov 192   ;;  %s3182_s6 = smov 12  }
  0x29   : > { %p584_p6 = scmp.lt.s32.totalorder %s3179_s18, 5  ;;  %s2383_s5 = sshll.u32 %s3327_s21, 7 }
  0x2a   : > { %s2667_s4 = sshll.u32 %s3171_s16, 7  ;;  %s4004_s7 = sld [smem:[#allocation40_spill]] }
  0x2b   : > { %p3349_p7 = pnand %p2389_p5, %p584_p6  ;;  %s4005_s9 = sld [smem:[#allocation42_spill]] }
  0x2c   : > { %s457_s15 = scalar_lea.hbm %s4002_s1, %s2734_s22  ;;  %s521_s22 = scalar_lea.vmem [#allocation9], %s2383_s5 }
  0x2d   : > { %s458_s12 = sshll.u32 %s457_s15, 4  ;;  %s529_s23 = sshll.u32 %s521_s22, 4  ;;  %s459_s12 = int_to_ptr.hbm [resolvable:$true] %s458_s12  ;;  %s530_s23 = int_to_ptr.vmem [resolvable:$true] %s529_s23 }
  0x2e   : > { %2755 = dma.hbm_to_vmem [thread:$0]  (!%p3333_p4), %s459_s12, 3072, %s461_s10, %s3341_s8, %s3181_s2, %s3181_s2, %s3182_s6  }
  0x2f   : > { %s3356_s2 = scalar_lea.sflag [#allocation10], %s448_s20  ;;  %s3183_s6 = smov 128  }
  0x30   : > { %s526_s11 = scalar_lea.hbm %s4004_s7, %s2667_s4  ;;  %s3184_s10 = smov 8  }
  0x31   : > { %s527_s1 = sshll.u32 %s526_s11, 4  ;;  %s555_s19 = scalar_lea.hbm %s4005_s9, %s2667_s4  ;;  %s528_s1 = int_to_ptr.hbm [resolvable:$true] %s527_s1 }
  0x32   : > { %2761 = dma.hbm_to_vmem [thread:$0]  (!%p3333_p4), %s528_s1, 2048, %s530_s23, %s3356_s2, %s3183_s6, %s3183_s6, %s3184_s10  }
  0x33   : > { %s550_s11 = scalar_lea.vmem [#allocation11], %s2383_s5  ;;  %s556_s22 = sshll.u32 %s555_s19, 4  ;;  %s3366_s22 = int_to_ptr.hbm [resolvable:$true] %s556_s22 }
  0x34   : > { %s558_s20 = sshll.u32 %s550_s11, 4  ;;  %s3369_s1 = sadd.s32 4294967295, %s3179_s18   ;;  %s3364_s20 = int_to_ptr.vmem [resolvable:$true] %s558_s20 }
  0x35   : > { %s2374_s23 = sadd.s32 4294967294, %s3179_s18   ;;  %s44_s6 = sadd.s32 1, %s3171_s16 }
  0x36   : > { %p45_p8 = scmp.ge.s32.totalorder %s44_s6, 2  ;;  %s47_s4 = sadd.s32 1, %s3175_s17 }
  0x37   : > { %s54_s5 = sadd.s32 1, %s3159_s30  ;;  %p61_p9 = scmp.ne.s32.totalorder %s3159_s30, %s3155_s29 }
  0x38   : > { %s4057_s6 = smov (%p45_p8, %s44_s6), 0  ;;  %s4059_s4 = smov (!%p45_p8, %s47_s4), %s3175_s17 }
  0x39   : > { %4006 = sst [smem:[#allocation27_spill]] %s4057_s6  ;;  %p3385_p10 = por %p62_p0, %p61_p9 }
  0x3a   : > { %p67_p11 = scmp.ne.s32.totalorder %s3155_s29, %s3151_s28  ;;  %p49_p12 = scmp.ge.s32.totalorder %s4059_s4, 2 }
  0x3b   : > { %p68_p13 = scmp.eq.s32.totalorder %s3369_s1, 0  ;;  %s77_s12 = ssub.s32 %s3171_s16, %s4057_s6 }
  0x3c   : > { %p93_p1 = scmp.ne.s32.totalorder %s3143_s26, %s3139_s25  ;;  %s4061_s4 = smov (%p49_p12, %s4059_s4), 0 }
  0x3d   : > { %4008 = sst [smem:[#allocation28_spill]] %s4061_s4  ;;  %p3401_p3 = por %p68_p13, %p67_p11 }
  0x3e   : > { %p78_p0 = scmp.eq.s32.totalorder %s77_s12, 0  ;;  %s51_s19 = ssub.s32 %s3175_s17, %s4061_s4 }
  0x3f   : > { %p3407_p5 = por %p93_p1, %p68_p13  ;;  %p52_p6 = scmp.eq.s32.totalorder %s51_s19, 0 }
  0x40   : > { %p403_p8 = scmp.eq.s32.totalorder %s3369_s1, 3  ;;  %s4012_s7 = sadd.s32 1, %s3147_s27 }
  0x41   : > { %s4010_s11 = scalar_select %p3407_p5, 1, 0 }
  0x42   : > { %s3415_s25 = scalar_select %p78_p0, %s3147_s27, %s4012_s7  }
  0x43   : > { %4011 = sst [smem:[#allocation29_spill]] %s4010_s11  ;;  %p3423_p12 = por %p403_p8, %p61_p9 }
  0x44   : > { %4013 = sst [smem:[#allocation30_spill]] %s3415_s25  ;;  %p409_p13 = scmp.eq.s32.totalorder %s2374_s23, 3 }
  0x45   : > { %s3418_s9 = scalar_select %p52_p6, %s3159_s30, %s54_s5  }
  0x46   : > { %s429_s12 = sand.u32 1, %s3159_s30   ;;  %s2378_s4 = sshll.u32 %s3175_s17, 3 }
  0x47   : > { %4014 = sst [smem:[#allocation31_spill]] %s3418_s9  ;;  %p3432_p1 = por %p409_p13, %p67_p11 }
  0x48   : > { %s2377_s14 = sshll.u32 %s429_s12, 3  ;;  %s4018_s0 = sld [smem:[#allocation33_spill]] }
  0x49   : > { %s4016_s19 = scalar_select %p3432_p1, 1, 0 }
  0x4a   : > { %s433_s9 = scalar_lea.vmem [#allocation3], %s2377_s14  ;;  %p2750_p9 = pnand %p2769_p2, %p3385_p10 }
  0x4b   : > { %4017 = sst [smem:[#allocation32_spill]] %s4016_s19  ;;  %s441_s27 = sshll.u32 %s433_s9, 4  ;;  %s442_s27 = int_to_ptr.vmem [resolvable:$true] %s441_s27 }
  0x4c   : > { %s2380_s23 = sshll.u32 %s3327_s21, 6  ;;  %s2666_s17 = sshll.u32 %s3171_s16, 6 }
  0x4d   : > { %s430_s30 = scalar_lea.sflag [#allocation4], %s429_s12  ;;  %s4019_s3 = sld [smem:[#allocation36_spill]] }
  0x4e   : > { %s437_s25 = scalar_lea.hbm %s4018_s0, %s2378_s4  ;;  %s481_s14 = scalar_lea.vmem [#allocation8], %s2380_s23 }
  0x4f   : > { %s439_s5 = sshll.u32 %s437_s25, 4  ;;  %s489_s7 = sshll.u32 %s481_s14, 4  ;;  %s440_s5 = int_to_ptr.hbm [resolvable:$true] %s439_s5  ;;  %s490_s7 = int_to_ptr.vmem [resolvable:$true] %s489_s7 }
  0x50   : > { %2752 = dma.hbm_to_vmem [thread:$0]  (!%p2750_p9), %s440_s5, 128, %s442_s27, %s430_s30  }
  0x51   : > { %s3185_s9 = smov 64   ;;  %s3186_s19 = smov 4  }
  0x52   : > { %2764 = dma.hbm_to_vmem [thread:$0]  (!%p3333_p4), %s3366_s22, 2048, %s3364_s20, %s3356_s2, %s3185_s9, %s3185_s9, %s3186_s19  }
  0x53   : > { %s486_s25 = scalar_lea.hbm %s4019_s3, %s2666_s17  ;;  %588 = sbr.rel (%p3349_p7) target bundleno = 2094 (0x82e), region = 72 }
  0x54   : > { %s487_s0 = sshll.u32 %s486_s25, 4  ;;  %s3459_s27 = sand.u32 (!%p3349_p7), 1, %s3155_s29   ;;  %s488_s0 = int_to_ptr.hbm [resolvable:$true] %s487_s0 }
  0x55   : > { %2758 = dma.hbm_to_vmem [thread:$0]  (!%p3333_p4), %s488_s0, 1024, %s490_s7, %s3341_s8, %s3185_s9, %s3185_s9, %s3186_s19  }
  0x56   : > { %s3970_s30 = sshll.u32 (!%p3349_p7), %s3459_s27, 3  ;;  %s591_s17 = scalar_lea.sflag (!%p3349_p7), [#allocation4], %s3459_s27 }
  0x57   : > { %s3465_s21 = scalar_lea.vmem (!%p3349_p7), [#allocation3], %s3970_s30 }
  0x58   : > { %3122 = dma.done.wait (%p3401_p3), %s591_s17, 128  }
  0x59   : > { %3124 = vsyncadd (%p3401_p3), %s591_s17, 4294967168  ;;  %s600_s8 = sand.u32 1, %s3369_s1   ;;  %s602_s24 = sand.u32 1, %s3143_s26  }
  0x5a   : > { %s2735_s13 = smul.u32 192, %s602_s24  ;;  %s601_s2 = scalar_lea.sflag [#allocation7], %s600_s8 }
  0x5c   : > { %s3473_s20 = scalar_lea.vmem [#allocation6], %s2735_s13 }
  0x5d   : > { %3126 = dma.done.wait (%p3407_p5), %s601_s2, 4096  }
  0x5e   : > { %3128 = vsyncadd (%p3407_p5), %s601_s2, 4294963200  ;;  %s2391_s22 = sshll.u32 %s602_s24, 6  ;;  %s2392_s10 = sshll.u32 %s602_s24, 7 }
  0x5f   : > { %s3479_s12 = scalar_lea.vmem [#allocation8], %s2391_s22  ;;  %s621_s15 = scalar_lea.sflag [#allocation10], %s600_s8 }
  0x60   : > { %s3481_s19 = scalar_lea.vmem [#allocation9], %s2392_s10 }
  0x61   : > { %3130 = dma.done.wait (%p3407_p5), %s621_s15, 4096  }
  0x62   : > { %3132 = vsyncadd (%p3407_p5), %s621_s15, 4294963200  ;;  %s4021_s1 = sld [smem:[#allocation22_spill]] }
  0x63   : > { %s4022_s25 = sld [smem:[#allocation37_spill]] }
  0x64   : > { %s4025_s30 = sld [smem:[#allocation35_spill]] }
  0x65   : > { %s4026_s28 = sld [smem:[#allocation41_spill]] }
  0x66   : > { %s4028_s0 = sld [smem:[#allocation44_spill]] }
  0x67   : > { %s4029_s2 = sld [smem:[#allocation45_spill]] }
  0x68   : > { %p724_p2 = scmp.lt.s32.totalorder %s4021_s1, 1  ;;  %p2396_p4 = scmp.ne.s32.totalorder %s4021_s1, 0 }
  0x6a   : > { %s3489_s5 = scalar_select %p724_p2, %s4021_s1, 1 }
  0x6c   : > { %s2736_s23 = smul.u32 3, %s3489_s5  ;;  %s730_s14 = scalar_lea.vmem %s4022_s25, %s3489_s5 }
  0x6d   : > { %s2395_s16 = sshll.u32 %s3489_s5, 1  ;;  %s4027_s25 = sld [smem:[#allocation43_spill]] }
  0x6e   : > { %s3507_s3 = scalar_lea.vmem %s4025_s30, %s2736_s23  ;;  %s3513_s18 = scalar_lea.vmem %s4026_s28, %s2395_s16 }
  0x6f   : > { %s746_s8 = scalar_lea.vmem %s4028_s0, %s3489_s5  ;;  %s749_s22 = scalar_lea.vmem %s4029_s2, %s3489_s5 }
  0x70   : > { %s3527_s30 = scalar_lea.vmem [#allocation11], %s2392_s10  ;;  %s4030_s23 = sshll.u32 %s3459_s27, 3 }
  0x71   : > { %s3531_s15 = scalar_lea.vmem [#allocation12], %s4030_s23  ;;  %754 = sbr.rel (%p2396_p4) target bundleno = 120 (0x78), region = 96 }
  0x73   : > { %s743_s7 = scalar_lea.vmem %s4027_s25, %s3489_s5 }
  0x76   : > { %v755_v0 = vld [vmem:[%s3465_s21] sm:$0xff] }
  0x77   : > { %756 = vst [vmem:[#allocation2] sm:$0xff] %v755_v0 }
  0x78 PF: > { %v2690_v1 = vld [vmem:[%s3473_s20 + $0xac] sm:$0xf]  ;;  %v2485_v2 = vld [vmem:[%s3473_s20 + $0xb4] sm:$0xf0]  ;;  %v2687_v3 = vld [vmem:[%s3473_s20 + $0x94] sm:$0xf] }
  0x79   : > { %v2488_v4 = vor.u32 %v2690_v1, %v2485_v2  ;;  %v2473_v5 = vld [vmem:[%s3473_s20 + $0x9c] sm:$0xf0]  ;;  %v2483_v6 = vld [vmem:[%s3473_s20 + $0xa8] sm:$0xf]  ;;  %v2691_v7 = vld [vmem:[%s3473_s20 + $0xb0] sm:$0xf0] }
  0x7a   : > { %v2484_v8 = vor.u32 %v2691_v7, %v2483_v6  ;;  %v2471_v9 = vld [vmem:[%s3473_s20 + $0x90] sm:$0xf]  ;;  %v2476_v10 = vor.u32 %v2687_v3, %v2473_v5  ;;  %v2688_v11 = vld [vmem:[%s3473_s20 + $0x98] sm:$0xf0]  ;;  %v2461_v13 = vld [vmem:[%s3473_s20 + $0x84] sm:$0xf0] }
  0x7b   : > { %940 = vmatpush.bf16.msra.mxu1 %v2488_v4  ;;  %v2684_v12 = vld [vmem:[%s3473_s20 + $0x7c] sm:$0xf]  ;;  %v2472_v14 = vor.u32 %v2688_v11, %v2471_v9  ;;  %v2459_v15 = vld [vmem:[%s3473_s20 + $0x78] sm:$0xf]  ;;  %v2685_v16 = vld [vmem:[%s3473_s20 + $0x80] sm:$0xf0] }
  0x7c   : > { %927 = vmatpush.bf16.msra.mxu0 %v2484_v8  ;;  %v2464_v17 = vor.u32 %v2684_v12, %v2461_v13  ;;  %v2681_v18 = vld [vmem:[%s3473_s20 + $0x64] sm:$0xf]  ;;  %v2449_v19 = vld [vmem:[%s3473_s20 + $0x6c] sm:$0xf0]  ;;  %v2460_v20 = vor.u32 %v2685_v16, %v2459_v15  ;;  %v2447_v21 = vld [vmem:[%s3473_s20 + $0x60] sm:$0xf] }
  0x7d   : > { %v2682_v22 = vld [vmem:[%s3473_s20 + $0x68] sm:$0xf0]  ;;  %v2452_v24 = vor.u32 %v2681_v18, %v2449_v19  ;;  %v2437_v25 = vld [vmem:[%s3473_s20 + $0x54] sm:$0xf0]  ;;  %v2435_v27 = vld [vmem:[%s3473_s20 + $0x48] sm:$0xf] }
  0x7e   : > { %v2678_v23 = vld [vmem:[%s3473_s20 + $0x4c] sm:$0xf]  ;;  %v2448_v26 = vor.u32 %v2682_v22, %v2447_v21  ;;  %v2679_v28 = vld [vmem:[%s3473_s20 + $0x50] sm:$0xf0]  ;;  %v2425_v31 = vld [vmem:[%s3473_s20 + $0x3c] sm:$0xf0] }
  0x7f   : > { %941 = vmatpush.bf16.msra.mxu1 %v2476_v10  ;;  %v2440_v29 = vor.u32 %v2678_v23, %v2437_v25  ;;  %v2675_v30 = vld [vmem:[%s3473_s20 + $0x34] sm:$0xf]  ;;  %v2436_v32 = vor.u32 %v2679_v28, %v2435_v27  ;;  %v2423_v33 = vld [vmem:[%s3473_s20 + $0x30] sm:$0xf]  ;;  %v2676_v34 = vld [vmem:[%s3473_s20 + $0x38] sm:$0xf0] }
  0x80   : > { %928 = vmatpush.bf16.msra.mxu0 %v2472_v14  ;;  %v2428_v35 = vor.u32 %v2675_v30, %v2425_v31  ;;  %v2672_v36 = vld [vmem:[%s3473_s20 + $0x1c] sm:$0xf]  ;;  %v2413_v37 = vld [vmem:[%s3473_s20 + $0x24] sm:$0xf0]  ;;  %v2424_v38 = vor.u32 %v2676_v34, %v2423_v33  ;;  %v2411_v39 = vld [vmem:[%s3473_s20 + $0x18] sm:$0xf] }
  0x81   : > { %v2673_v40 = vld [vmem:[%s3473_s20 + $0x20] sm:$0xf0]  ;;  %v2416_v41 = vor.u32 %v2672_v36, %v2413_v37  ;;  %v2401_v43 = vld [vmem:[%s3473_s20 + $0xc] sm:$0xf0]  ;;  %v2399_v45 = vld [vmem:[%s3473_s20] sm:$0xf] }
  0x82   : > { %v2669_v42 = vld [vmem:[%s3473_s20 + $0x4] sm:$0xf]  ;;  %v2412_v44 = vor.u32 %v2673_v40, %v2411_v39  ;;  %v2670_v46 = vld [vmem:[%s3473_s20 + $0x8] sm:$0xf0]  ;;  %v3576_v51 = vld [vmem:[%s3507_s3] sm:$0x7] }
  0x83   : > { %942 = vmatpush.bf16.msra.mxu1 %v2464_v17  ;;  %v2404_v47 = vor.u32 %v2669_v42, %v2401_v43  ;;  %v3567_v48 = vld [vmem:[#allocation2] sm:$0xff]  ;;  %v2400_v49 = vor.u32 %v2670_v46, %v2399_v45  ;;  %v794_v52 = vperm.slane %v3576_v51, 1  ;;  %v793_v53 = vperm.slane %v3576_v51, 0  ;;  %s3187_s26 = smov 32   ;;  %s3188_s3 = smov 96  }
  0x84   : > { %929 = vmatpush.bf16.msra.mxu0 %v2460_v20  ;;  %v3571_v50 = vpack.c.bf16 %v3567_v48, %v3567_v48  ;;  %s3189_s28 = smov 64   ;;  %v2491_v63 = vld [vmem:[%s3473_s20 + $0xb0] sm:$0xf]  ;;  %v2692_v0 = vld [vmem:[%s3473_s20 + $0xb8] sm:$0xf0]  ;;  %vm997_vm0 = vcmask 1047556  }
  0x85   : > { %v2479_v1 = vld [vmem:[%s3473_s20 + $0x98] sm:$0xf]  ;;  %v2492_v2 = vor.u32 %v2692_v0, %v2491_v63  ;;  %v2689_v3 = vld [vmem:[%s3473_s20 + $0xa0] sm:$0xf0]  ;;  %v3190_v4 = vmov 1983009808  }
  0x86   : > { %v988_v5 = vunpack.c.l.s4 %v3190_v4  ;;  %v2480_v6 = vor.u32 %v2689_v3, %v2479_v1  ;;  %v2467_v17 = vld [vmem:[%s3473_s20 + $0x80] sm:$0xf]  ;;  %v2686_v18 = vld [vmem:[%s3473_s20 + $0x88] sm:$0xf0]  ;;  %v3191_v21 = vmov 1934713408  }
  0x87   : > { %943 = vmatpush.bf16.msra.mxu1 %v2452_v24  ;;  %953 = vmatpush.bf16.msra.mxu2 %v2492_v2  ;;  %v2468_v20 = vor.u32 %v2686_v18, %v2467_v17  ;;  %v1002_v22 = vunpack.c.l.s4 %v3191_v21  ;;  %v2455_v23 = vld [vmem:[%s3473_s20 + $0x68] sm:$0xf]  ;;  %v2683_v24 = vld [vmem:[%s3473_s20 + $0x70] sm:$0xf0]  ;;  %v2443_v46 = vld [vmem:[%s3473_s20 + $0x50] sm:$0xf] }
  0x88   : > { %930 = vmatpush.bf16.msra.mxu0 %v2448_v26  ;;  %v3595_v10 = vunpack.c.0.s8 %v988_v5  ;;  %v2456_v28 = vor.u32 %v2683_v24, %v2455_v23  ;;  %vm1333_vm1 = vcmask 261120   ;;  %vm1410_vm2 = vcmask 64512   ;;  %s4034_s0 = sld [smem:[#allocation39_spill]] }
  0x89   : > { %vm1462_vm3 = vcmask 1043456   ;;  %vm1660_vm4 = vcmask 523264   ;;  %vm1662_vm5 = vcmask 785408  }
  0x8b   : > { %944 = vmatpush.bf16.msra.mxu1 %v2440_v29  ;;  %954 = vmatpush.bf16.msra.mxu2 %v2480_v6 }
  0x8c   : > { %931 = vmatpush.bf16.msra.mxu0 %v2436_v32 }
  0x8e   : > { %s4035_s2 = scalar_lea.vmem %s4034_s0, %s3489_s5 }
  0x8f   : > { %945 = vmatpush.bf16.msra.mxu1 %v2428_v35  ;;  %955 = vmatpush.bf16.msra.mxu2 %v2468_v20 }
  0x90   : > { %932 = vmatpush.bf16.msra.mxu0 %v2424_v38 }
  0x93   : > { %946 = vmatpush.bf16.msra.mxu1 %v2416_v41  ;;  %v3607_v41 = vunpack.c.0.s8 %v1002_v22  ;;  %956 = vmatpush.bf16.msra.mxu2 %v2456_v28 }
  0x94   : > { %933 = vmatpush.bf16.msra.mxu0 %v2412_v44 }
  0x97   : > { %947 = vmatpush.bf16.msra.mxu1 %v2404_v47  ;;  %v2680_v47 = vld [vmem:[%s3473_s20 + $0x58] sm:$0xf0] }
  0x98   : > { %934 = vmatpush.bf16.msra.mxu0 %v2400_v49 }
  0x9a   : > { %948 = vmatmul.bf16.vlgmr.msra.gmra.mxu1 %v3571_v50 }
  0x9b   : > { %935 = vmatmul.bf16.vlgmr.msra.gmra.mxu0 %v3571_v50 }
 0x117   : > { %v949_v54 = vpop.f32.mrf.mxu1 }
 0x118   : > { %v950_v55 = vadd.f32 %v949_v54, %v794_v52  ;;  %v936_v56 = vpop.f32.mrf.mxu0  ;;  %v2444_v52 = vor.u32 %v2680_v47, %v2443_v46  ;;  %v2674_v46 = vld [vmem:[%s3473_s20 + $0x28] sm:$0xf0] }
 0x119   : > { %v937_v57 = vadd.f32 %v936_v56, %v793_v53 }
 0x11a   : > { %v1089_v58 = vpack.c.bf16 %v950_v55, %v950_v55  ;;  %957 = vmatpush.bf16.msra.mxu2 %v2444_v52 }
 0x11b   : > { %v3580_v59 = vpack.c.bf16 %v937_v57, %v937_v57 }
 0x11c   : > { %1095 = vrot.lane.b32.xlu1 %v1089_v58, %s3187_s26  ;;  %1091 = vrot.lane.b32.xlu0 %v1089_v58, %s3188_s3  ;;  %v1100_v11 = vshrl.u32 %v1089_v58, 16 }
 0x11d   : > { %970 = vrot.lane.b32.xlu2 %v3580_v59, %s3189_s28  ;;  %v977_v33 = vshrl.u32 %v3580_v59, 16 }
 0x11f   : > { %v951_v60 = vpop.f32.mrf.mxu1 }
 0x120   : > { %v938_v61 = vpop.f32.mrf.mxu0 }
 0x124   : > { %1093 = vrot.lane.b32.xlu0 %v1089_v58, %s3189_s28  ;;  %968 = vrot.lane.b32.xlu1 %v3580_v59, %s3188_s3 }
 0x125   : > { %972 = vrot.lane.b32.xlu2 %v3580_v59, %s3187_s26 }
 0x177   : > { %v971_v62 = vpop.permute.xlu2 %970 }
 0x178   : > { %v983_v13 = vshrl.u32 %v971_v62, 16 }
 0x17f   : > { %v973_v7 = vpop.permute.xlu2 %972 }
 0x180   : > { %v982_v14 = vpack.i.b16 %v973_v7, %v971_v62  ;;  %v984_v15 = vshrl.u32 %v973_v7, 16 }
 0x182   : > { %v985_v25 = vpack.i.b16 %v984_v15, %v983_v13  ;;  %v995_v26 = vperm.slane %v982_v14, %v3595_v10 }
 0x184   : > { %v996_v38 = vrot.slane %v995_v26, 4  ;;  %v1022_v39 = vperm.slane %v985_v25, %v3595_v10 }
 0x186   : > { %v1023_v57 = vrot.slane %v1022_v39, 4 }
 0x18e   : > { %v1096_v8 = vpop.permute.xlu1 %1095  ;;  %v1092_v9 = vpop.permute.xlu0 %1091 }
 0x18f   : > { %v1101_v12 = vshrl.u32 %v1092_v9, 16  ;;  %v1099_v16 = vpack.i.b16 %v1092_v9, %v1089_v58  ;;  %v1107_v29 = vshrl.u32 %v1096_v8, 16 }
 0x191   : > { %v1102_v19 = vpack.i.b16 %v1101_v12, %v1100_v11  ;;  %v1113_v27 = vperm.slane %v1099_v16, %v3595_v10 }
 0x193   : > { %v1139_v30 = vperm.slane %v1102_v19, %v3595_v10  ;;  %v1121_v40 = vrot.slane %v1113_v27, 4 }
 0x195   : > { %v1147_v49 = vrot.slane %v1139_v30, 4 }
 0x196   : > { %v1094_v31 = vpop.permute.xlu0 %1093  ;;  %v969_v32 = vpop.permute.xlu1 %968 }
 0x197   : > { %v1105_v34 = vpack.i.b16 %v1096_v8, %v1094_v31  ;;  %v1106_v35 = vshrl.u32 %v1094_v31, 16  ;;  %v976_v36 = vpack.i.b16 %v969_v32, %v3580_v59  ;;  %v978_v37 = vshrl.u32 %v969_v32, 16 }
 0x199   : > { %v1108_v42 = vpack.i.b16 %v1107_v29, %v1106_v35  ;;  %v1118_v43 = vperm.slane %v1105_v34, %v3595_v10  ;;  %v979_v44 = vpack.i.b16 %v978_v37, %v977_v33  ;;  %v990_v45 = vperm.slane %v976_v36, %v3595_v10  ;;  %v2431_v35 = vld [vmem:[%s3473_s20 + $0x38] sm:$0xf]  ;;  %v2677_v36 = vld [vmem:[%s3473_s20 + $0x40] sm:$0xf0] }
 0x19b   : > { %v1119_v53 = vrot.slane %v1118_v43, 4  ;;  %v1122_v54 = vsel %vm997_vm0, %v1118_v43, %v1121_v40  ;;  %v1144_v55 = vperm.slane %v1108_v42, %v3595_v10  ;;  %v998_v56 = vsel %vm997_vm0, %v996_v38, %v990_v45 }
 0x19c   : > { %v1130_v58 = vperm.slane %v1122_v54, %v3607_v41  ;;  %v999_v59 = vrot.slane %v990_v45, 4  ;;  %v1017_v60 = vperm.slane %v979_v44, %v3595_v10  ;;  %v1004_v0 = vperm.slane %v998_v56, %v3607_v41  ;;  %v2419_v45 = vld [vmem:[%s3473_s20 + $0x20] sm:$0xf] }
 0x19d   : > { %v1120_v61 = vsel %vm997_vm0, %v1119_v53, %v1113_v27  ;;  %v1145_v62 = vrot.slane %v1144_v55, 4  ;;  %v1148_v63 = vsel %vm997_vm0, %v1144_v55, %v1147_v49  ;;  %v2432_v53 = vor.u32 %v2677_v36, %v2431_v35 }
 0x19e   : > { %v1126_v1 = vperm.slane %v1120_v61, %v3607_v41  ;;  %v1133_v2 = vrot.slane %v1130_v58, 4  ;;  %v1156_v3 = vperm.slane %v1148_v63, %v3607_v41  ;;  %v1000_v4 = vsel %vm997_vm0, %v995_v26, %v999_v59 }
 0x19f   : > { %v1146_v5 = vsel %vm997_vm0, %v1145_v62, %v1139_v30  ;;  %v1008_v6 = vperm.slane %v1000_v4, %v3607_v41  ;;  %v1024_v7 = vsel %vm997_vm0, %v1023_v57, %v1017_v60  ;;  %v1009_v14 = vrot.slane %v1004_v0, 4  ;;  %958 = vmatpush.bf16.msra.mxu2 %v2432_v53 }
 0x1a0   : > { %v1131_v8 = vrot.slane %v1126_v1, 4  ;;  %v1134_v9 = vsel %vm997_vm0, 0, %v1133_v2  ;;  %v1152_v11 = vperm.slane %v1146_v5, %v3607_v41  ;;  %v1159_v12 = vrot.slane %v1156_v3, 4  ;;  %v2671_v3 = vld [vmem:[%s3473_s20 + $0x10] sm:$0xf0] }
 0x1a1   : > { %v1166_v13 = vrot.slane %v1134_v9, 4  ;;  %v1011_v15 = vrot.slane %v1008_v6, 4  ;;  %v1025_v16 = vrot.slane %v1017_v60, 4  ;;  %v1030_v20 = vperm.slane %v1024_v7, %v3607_v41 }
 0x1a2   : > { %v1132_v17 = vsel %vm997_vm0, 0, %v1131_v8  ;;  %v1157_v18 = vrot.slane %v1152_v11, 4  ;;  %v1160_v19 = vsel %vm997_vm0, 0, %v1159_v12  ;;  %v1010_v27 = vsel %vm997_vm0, 0, %v1009_v14 }
 0x1a3   : > { %v1185_v21 = vrot.slane %v1160_v19, 4  ;;  %v1012_v22 = vsel %vm997_vm0, 0, %v1011_v15  ;;  %v1026_v23 = vsel %vm997_vm0, %v1022_v39, %v1025_v16  ;;  %v1161_v28 = vsel %vm997_vm0, %v1133_v2, %v1126_v1  ;;  %v2407_v2 = vld [vmem:[%s3473_s20 + $0x8] sm:$0xf] }
 0x1a4   : > { %v1034_v24 = vperm.slane %v1026_v23, %v3607_v41  ;;  %v1044_v25 = vrot.slane %v1012_v22, 4  ;;  %v1158_v26 = vsel %vm997_vm0, 0, %v1157_v18  ;;  %v1167_v29 = vsel %vm997_vm0, %v1166_v13, %v1132_v17 }
 0x1a5   : > { %v1186_v30 = vsel %vm997_vm0, %v1185_v21, %v1158_v26  ;;  %v1035_v31 = vrot.slane %v1030_v20, 4  ;;  %v1171_v33 = vperm.slane %v1167_v29, %v3595_v10  ;;  %v1180_v34 = vsel %vm997_vm0, %v1159_v12, %v1152_v11 }
 0x1a6   : > { %v1037_v32 = vrot.slane %v1034_v24, 4  ;;  %v1039_v37 = vsel %vm997_vm0, %v1011_v15, %v1004_v0  ;;  %v1190_v38 = vperm.slane %v1186_v30, %v3595_v10  ;;  %v1045_v39 = vsel %vm997_vm0, %v1044_v25, %v1010_v27 }
 0x1a7   : > { %v1165_v42 = vperm.slane %v1161_v28, %v3595_v10  ;;  %v1172_v43 = vrot.slane %v1171_v33, 4  ;;  %v1049_v44 = vperm.slane %v1045_v39, %v3595_v10  ;;  %v1184_v49 = vperm.slane %v1180_v34, %v3595_v10 }
 0x1a8   : > { %v1038_v40 = vsel %vm997_vm0, 0, %v1037_v32  ;;  %v1191_v52 = vrot.slane %v1190_v38, 4  ;;  %v1036_v54 = vsel %vm997_vm0, 0, %v1035_v31  ;;  %v1043_v56 = vperm.slane %v1039_v37, %v3595_v10 }
 0x1a9   : > { %v1063_v47 = vrot.slane %v1038_v40, 4  ;;  %v1173_v55 = vsel %vm997_vm0, %v1172_v43, %v1165_v42  ;;  %v1050_v57 = vrot.slane %v1049_v44, 4  ;;  %v2420_v61 = vor.u32 %v2674_v46, %v2419_v45 }
 0x1aa   : > { %v1177_v58 = vperm.slane %v1173_v55, %v3607_v41  ;;  %v1192_v59 = vsel %vm997_vm0, %v1191_v52, %v1184_v49  ;;  %v1058_v0 = vsel %vm997_vm0, %v1037_v32, %v1030_v20  ;;  %v2408_v14 = vor.u32 %v2671_v3, %v2407_v2 }
 0x1ab   : > { %v1064_v60 = vsel %vm997_vm0, %v1063_v47, %v1036_v54  ;;  %v1196_v62 = vperm.slane %v1192_v59, %v3607_v41  ;;  %v1051_v63 = vsel %vm997_vm0, %v1050_v57, %v1043_v56  ;;  %v1062_v13 = vperm.slane %v1058_v0, %v3595_v10  ;;  %959 = vmatpush.bf16.msra.mxu2 %v2420_v61 }
 0x1ac   : > { %v1068_v1 = vperm.slane %v1064_v60, %v3595_v10  ;;  %v1202_v4 = vshrl.u32 %v1177_v58, 16  ;;  %v1178_v5 = vrot.slane %v1177_v58, 4  ;;  %v1055_v6 = vperm.slane %v1051_v63, %v3607_v41 }
 0x1ad   : > { %v1201_v7 = vpack.i.b16 %v1196_v62, %v1177_v58  ;;  %v1203_v8 = vshrl.u32 %v1196_v62, 16  ;;  %v1197_v9 = vrot.slane %v1196_v62, 4  ;;  %v795_v47 = vperm.slane %v3576_v51, 2 }
 0x1ae   : > { %v1069_v11 = vrot.slane %v1068_v1, 4  ;;  %v1179_v12 = vsel %vm997_vm0, 0, %v1178_v5  ;;  %v1056_v23 = vrot.slane %v1055_v6, 4  ;;  %v1080_v36 = vshrl.u32 %v1055_v6, 16 }
 0x1af   : > { %v1338_v15 = vsel %vm1333_vm1, %v1201_v7, 0  ;;  %v1204_v16 = vpack.i.b16 %v1203_v8, %v1202_v4  ;;  %v1198_v17 = vsel %vm997_vm0, 0, %v1197_v9  ;;  %v1208_v18 = vshrl.u32 %v1179_v12, 16  ;;  %960 = vmatpush.bf16.msra.mxu2 %v2408_v14 }
 0x1b0   : > { %1347 = vmatpush.bf16.xpose.msra.mxu3 %v1338_v15  ;;  %v1209_v19 = vshrl.u32 %v1198_v17, 16  ;;  %v1070_v20 = vsel %vm997_vm0, %v1069_v11, %v1062_v13  ;;  %v1207_v25 = vpack.i.b16 %v1198_v17, %v1179_v12  ;;  %v1057_v29 = vsel %vm997_vm0, 0, %v1056_v23 }
 0x1b1   : > { %v1357_v21 = vsel %vm1333_vm1, %v1204_v16, 0  ;;  %v1074_v22 = vperm.slane %v1070_v20, %v3607_v41  ;;  %v1086_v33 = vshrl.u32 %v1057_v29, 16 }
 0x1b2   : > { %v1210_v24 = vpack.i.b16 %v1209_v19, %v1208_v18  ;;  %961 = vmatmul.bf16.vlgmr.msra.gmra.mxu2 %v3571_v50  ;;  %v1376_v32 = vsel %vm1333_vm1, %v1207_v25, 0 }
 0x1b3   : > { %v1075_v26 = vrot.slane %v1074_v22, 4  ;;  %v1079_v28 = vpack.i.b16 %v1074_v22, %v1055_v6  ;;  %v1081_v35 = vshrl.u32 %v1074_v22, 16 }
 0x1b4   : > { %v1395_v27 = vsel %vm1333_vm1, %v1210_v24, 0 }
 0x1b5   : > { %1404 = vmatpush.bf16.xpose.msrb.mxu0 %v1395_v27  ;;  %v1076_v30 = vsel %vm997_vm0, 0, %v1075_v26  ;;  %v1082_v37 = vpack.i.b16 %v1081_v35, %v1080_v36 }
 0x1b6   : > { %v1087_v31 = vshrl.u32 %v1076_v30, 16  ;;  %v1085_v38 = vpack.i.b16 %v1076_v30, %v1057_v29 }
 0x1b7   : > { %2493 = vmatmul.msk.bf16.vlgmr.msra.gmra.mxu3 %vm1333_vm1, %v1079_v28 }
 0x1b8   : > { %1366 = vmatpush.bf16.xpose.msrb.mxu3 %v1357_v21  ;;  %v1088_v34 = vpack.i.b16 %v1087_v31, %v1086_v33 }
 0x1bc   : > { %2496 = vmatmul.msk.bf16.vlgmr.msrb.gmra.mxu0 %vm1333_vm1, %v1088_v34 }
 0x1c0   : > { %1385 = vmatpush.bf16.xpose.msra.mxu3 %v1376_v32 }
 0x1c7   : > { %2494 = vmatmul.msk.bf16.vlgmr.msrb.gmra.mxu3 %vm1333_vm1, %v1082_v37 }
 0x1d7   : > { %2495 = vmatmul.msk.bf16.vlgmr.msra.gmra.mxu3 %vm1333_vm1, %v1085_v38 }
 0x235   : > { %v962_v50 = vpop.f32.mrf.mxu2 }
 0x236   : > { %v963_v49 = vadd.f32 %v962_v50, %v795_v47 }
 0x238   : > { %v1211_v54 = vpack.c.bf16 %v963_v49, %v963_v49 }
 0x239   : > { %v1406_v39 = vpop.f32.mrf.mxu0 }
 0x23a   : > { %v1349_v40 = vpop.f32.mrf.mxu3  ;;  %v1420_v42 = vsel %vm1410_vm2, %v1406_v39, -inf  ;;  %v1222_v17 = vshrl.u32 %v1211_v54, 16 }
 0x23b   : > { %1421 = vmax.xlane.f32.xlu2 %v1420_v42  ;;  %v1411_v43 = vsel %vm1410_vm2, %v1349_v40, -inf }
 0x23c   : > { %1412 = vmax.xlane.f32.xlu0 %v1411_v43 }
 0x23d   : > { %v964_v44 = vpop.f32.mrf.mxu2 }
 0x241   : > { %v1408_v45 = vpop.f32.mrf.mxu0 }
 0x242   : > { %v1351_v46 = vpop.f32.mrf.mxu3 }
 0x24a   : > { %v1368_v52 = vpop.f32.mrf.mxu3 }
 0x24b   : > { %v1414_v53 = vsel %vm1410_vm2, %v1368_v52, -inf }
 0x24c   : > { %1415 = vmax.xlane.f32.xlu2 %v1414_v53 }
 0x250   : > { %1213 = vrot.lane.b32.xlu0 %v1211_v54, %s3188_s3 }
 0x252   : > { %v1370_v55 = vpop.f32.mrf.mxu3 }
 0x25a   : > { %v1387_v56 = vpop.f32.mrf.mxu3 }
 0x25b   : > { %v1417_v57 = vsel %vm1410_vm2, %v1387_v56, -inf }
 0x25c   : > { %1418 = vmax.xlane.f32.xlu1 %v1417_v57 }
 0x262   : > { %v1389_v58 = vpop.f32.mrf.mxu3 }
 0x264   : > { %1217 = vrot.lane.b32.xlu2 %v1211_v54, %s3187_s26 }
 0x275   : > { %1215 = vrot.lane.b32.xlu1 %v1211_v54, %s3189_s28 }
 0x2ae   : > { %v1422_v59 = vpop.xlane.xlu2 %1421 }
 0x2af   : > { %v1413_v51 = vpop.xlane.xlu0 %1412  ;;  %v1426_v61 = vsub.f32 %v1406_v39, %v1422_v59 }
 0x2b0   : > { %v1423_v60 = vsub.f32 %v1349_v40, %v1413_v51 }
 0x2b1   : > { %v1433_v63 = vmul.f32 1.442695, %v1426_v61 }
 0x2b2   : > { %v1427_v62 = vmul.f32 1.442695, %v1423_v60 }
 0x2b4   : > { %2877 = vpow2.f32 %v1427_v62 }
 0x2b5   : > { %2879 = vpow2.f32 %v1433_v63 }
 0x2ba   : > { %v3690_v0 = vpop.eup %2877 }
 0x2bb   : > { %v1435_v1 = vsel %vm1410_vm2, %v3690_v0, 0.0  ;;  %v3694_v3 = vpop.eup %2879 }
 0x2bc   : > { %1436 = vadd.xlane.f32.xlu0 %v1435_v1  ;;  %v1444_v6 = vsel %vm1410_vm2, %v3694_v3, 0.0 }
 0x2bf   : > { %v1416_v2 = vpop.xlane.xlu2 %1415 }
 0x2c0   : > { %v1424_v4 = vsub.f32 %v1368_v52, %v1416_v2 }
 0x2c2   : > { %v1429_v5 = vmul.f32 1.442695, %v1424_v4  ;;  %v1214_v15 = vpop.permute.xlu0 %1213 }
 0x2c3   : > { %v1223_v16 = vshrl.u32 %v1214_v15, 16  ;;  %v1221_v18 = vpack.i.b16 %v1214_v15, %v1211_v54 }
 0x2c4   : > { %2881 = vpow2.f32 %v1429_v5  ;;  %1445 = vadd.xlane.f32.xlu0 %v1444_v6 }
 0x2c5   : > { %v1224_v20 = vpack.i.b16 %v1223_v16, %v1222_v17  ;;  %v1235_v21 = vperm.slane %v1221_v18, %v3595_v10 }
 0x2c7   : > { %v1218_v19 = vpop.permute.xlu2 %1217  ;;  %v1261_v24 = vperm.slane %v1224_v20, %v3595_v10  ;;  %v1243_v27 = vrot.slane %v1235_v21, 4 }
 0x2c8   : > { %v1229_v22 = vshrl.u32 %v1218_v19, 16 }
 0x2c9   : > { %v1269_v30 = vrot.slane %v1261_v24, 4 }
 0x2ca   : > { %v3698_v7 = vpop.eup %2881 }
 0x2cb   : > { %v1438_v8 = vsel %vm1410_vm2, %v3698_v7, 0.0 }
 0x2cc   : > { %1439 = vadd.xlane.f32.xlu2 %v1438_v8 }
 0x2cf   : > { %v1419_v9 = vpop.xlane.xlu1 %1418 }
 0x2d0   : > { %v1425_v11 = vsub.f32 %v1387_v56, %v1419_v9 }
 0x2d2   : > { %v1431_v12 = vmul.f32 1.442695, %v1425_v11 }
 0x2d4   : > { %2883 = vpow2.f32 %v1431_v12 }
 0x2da   : > { %v3702_v13 = vpop.eup %2883 }
 0x2db   : > { %v1441_v14 = vsel %vm1410_vm2, %v3702_v13, 0.0 }
 0x2dc   : > { %1442 = vadd.xlane.f32.xlu1 %v1441_v14 }
 0x2e7   : > { %v1216_v23 = vpop.permute.xlu1 %1215 }
 0x2e8   : > { %v1227_v25 = vpack.i.b16 %v1218_v19, %v1216_v23  ;;  %v1228_v26 = vshrl.u32 %v1216_v23, 16 }
 0x2ea   : > { %v1230_v28 = vpack.i.b16 %v1229_v22, %v1228_v26  ;;  %v1240_v29 = vperm.slane %v1227_v25, %v3595_v10 }
 0x2ec   : > { %v1241_v31 = vrot.slane %v1240_v29, 4  ;;  %v1244_v32 = vsel %vm997_vm0, %v1240_v29, %v1243_v27  ;;  %v1266_v33 = vperm.slane %v1230_v28, %v3595_v10 }
 0x2ed   : > { %v1252_v34 = vperm.slane %v1244_v32, %v3607_v41 }
 0x2ee   : > { %v1242_v35 = vsel %vm997_vm0, %v1241_v31, %v1235_v21  ;;  %v1267_v36 = vrot.slane %v1266_v33, 4  ;;  %v1270_v37 = vsel %vm997_vm0, %v1266_v33, %v1269_v30 }
 0x2ef   : > { %v1248_v38 = vperm.slane %v1242_v35, %v3607_v41  ;;  %v1255_v50 = vrot.slane %v1252_v34, 4  ;;  %v1278_v39 = vperm.slane %v1270_v37, %v3607_v41 }
 0x2f0   : > { %v1268_v40 = vsel %vm997_vm0, %v1267_v36, %v1261_v24 }
 0x2f1   : > { %v1253_v42 = vrot.slane %v1248_v38, 4  ;;  %v1256_v43 = vsel %vm997_vm0, 0, %v1255_v50  ;;  %v1274_v44 = vperm.slane %v1268_v40, %v3607_v41  ;;  %v1281_v45 = vrot.slane %v1278_v39, 4 }
 0x2f2   : > { %v1288_v46 = vrot.slane %v1256_v43, 4  ;;  %v1283_v54 = vsel %vm997_vm0, %v1255_v50, %v1248_v38 }
 0x2f3   : > { %v1254_v47 = vsel %vm997_vm0, 0, %v1253_v42  ;;  %v1279_v49 = vrot.slane %v1274_v44, 4  ;;  %v1282_v52 = vsel %vm997_vm0, 0, %v1281_v45  ;;  %v1302_v58 = vsel %vm997_vm0, %v1281_v45, %v1274_v44 }
 0x2f4   : > { %v1307_v53 = vrot.slane %v1282_v52, 4  ;;  %v1289_v55 = vsel %vm997_vm0, %v1288_v46, %v1254_v47  ;;  %v1287_v51 = vperm.slane %v1283_v54, %v3595_v10  ;;  %v1306_v63 = vperm.slane %v1302_v58, %v3595_v10 }
 0x2f5   : > { %v1280_v56 = vsel %vm997_vm0, 0, %v1279_v49  ;;  %v1293_v57 = vperm.slane %v1289_v55, %v3595_v10 }
 0x2f6   : > { %v1308_v59 = vsel %vm997_vm0, %v1307_v53, %v1280_v56 }
 0x2f7   : > { %v1294_v60 = vrot.slane %v1293_v57, 4  ;;  %v1312_v61 = vperm.slane %v1308_v59, %v3595_v10 }
 0x2f9   : > { %v1295_v62 = vsel %vm997_vm0, %v1294_v60, %v1287_v51  ;;  %v1313_v1 = vrot.slane %v1312_v61, 4 }
 0x2fa   : > { %v1299_v2 = vperm.slane %v1295_v62, %v3607_v41 }
 0x2fb   : > { %v1314_v4 = vsel %vm997_vm0, %v1313_v1, %v1306_v63 }
 0x2fc   : > { %v1318_v5 = vperm.slane %v1314_v4, %v3607_v41  ;;  %v1300_v6 = vrot.slane %v1299_v2, 4  ;;  %v1324_v8 = vshrl.u32 %v1299_v2, 16 }
 0x2fe   : > { %v1323_v9 = vpack.i.b16 %v1318_v5, %v1299_v2  ;;  %v1325_v11 = vshrl.u32 %v1318_v5, 16  ;;  %v1301_v12 = vsel %vm997_vm0, 0, %v1300_v6  ;;  %v1319_v14 = vrot.slane %v1318_v5, 4 }
 0x2ff   : > { %v1330_v19 = vshrl.u32 %v1301_v12, 16 }
 0x300   : > { %v1464_v15 = vsel %vm1462_vm3, %v1323_v9, 0  ;;  %v1326_v16 = vpack.i.b16 %v1325_v11, %v1324_v8  ;;  %v1320_v17 = vsel %vm997_vm0, 0, %v1319_v14 }
 0x301   : > { %1473 = vmatpush.bf16.msrb.mxu2 %v1464_v15  ;;  %v1329_v18 = vpack.i.b16 %v1320_v17, %v1301_v12  ;;  %v1331_v20 = vshrl.u32 %v1320_v17, 16 }
 0x302   : > { %v1483_v21 = vsel %vm1462_vm3, %v1326_v16, 0 }
 0x303   : > { %v1502_v22 = vsel %vm1462_vm3, %v1329_v18, 0  ;;  %v1332_v23 = vpack.i.b16 %v1331_v20, %v1330_v19 }
 0x304   : > { %1511 = vmatpush.bf16.msrb.mxu3 %v1502_v22 }
 0x305   : > { %1492 = vmatpush.bf16.msra.mxu2 %v1483_v21  ;;  %v1521_v24 = vsel %vm1462_vm3, %v1332_v23, 0 }
 0x306   : > { %1530 = vmatpush.bf16.msra.mxu0 %v1521_v24 }
 0x32f   : > { %v1437_v25 = vpop.xlane.xlu0 %1436 }
 0x330   : > { %2885 = vrcp.f32 %v1437_v25 }
 0x336   : > { %v2886_v26 = vpop.eup %2885 }
 0x337   : > { %v1451_v27 = vmul.f32 %v2886_v26, %v3690_v0  ;;  %v1446_v28 = vpop.xlane.xlu0 %1445 }
 0x338   : > { %2887 = vrcp.f32 %v1446_v28 }
 0x339   : > { %v1455_v29 = vpack.c.bf16 %v1451_v27, %v1451_v27 }
 0x33b   : > { %2497 = vmatmul.msk.bf16.vlgmr.msrb.gmra.mxu2 %vm1410_vm2, %v1455_v29 }
 0x33e   : > { %v2888_v30 = vpop.eup %2887 }
 0x33f   : > { %v1454_v31 = vmul.f32 %v2888_v30, %v3694_v3  ;;  %v1440_v32 = vpop.xlane.xlu2 %1439 }
 0x340   : > { %2889 = vrcp.f32 %v1440_v32 }
 0x341   : > { %v1458_v33 = vpack.c.bf16 %v1454_v31, %v1454_v31 }
 0x343   : > { %2500 = vmatmul.msk.bf16.vlgmr.msra.gmra.mxu0 %vm1410_vm2, %v1458_v33 }
 0x346   : > { %v2890_v34 = vpop.eup %2889 }
 0x347   : > { %v1452_v35 = vmul.f32 %v2890_v34, %v3698_v7 }
 0x349   : > { %v1456_v36 = vpack.c.bf16 %v1452_v35, %v1452_v35 }
 0x34b   : > { %2498 = vmatmul.msk.bf16.vlgmr.msra.gmra.mxu2 %vm1410_vm2, %v1456_v36 }
 0x34f   : > { %v1443_v0 = vpop.xlane.xlu1 %1442 }
 0x350   : > { %2891 = vrcp.f32 %v1443_v0 }
 0x356   : > { %v2892_v37 = vpop.eup %2891 }
 0x357   : > { %v1453_v38 = vmul.f32 %v2892_v37, %v3702_v13 }
 0x359   : > { %v1457_v50 = vpack.c.bf16 %v1453_v38, %v1453_v38 }
 0x35b   : > { %2499 = vmatmul.msk.bf16.vlgmr.msrb.gmra.mxu3 %vm1410_vm2, %v1457_v50 }
 0x3be   : > { %v1475_v3 = vpop.f32.mrf.mxu2 }
 0x3bf   : > { %v1539_v52 = vrot.slane %v1475_v3, 4 }
 0x3c0   : > { %v1532_v39 = vpop.f32.mrf.mxu0 }
 0x3c1   : > { %v1549_v46 = vrot.slane %v1532_v39, 4 }
 0x3c6   : > { %v1477_v40 = vpop.f32.mrf.mxu2 }
 0x3c8   : > { %v1534_v42 = vpop.f32.mrf.mxu0 }
 0x3ce   : > { %v1494_v43 = vpop.f32.mrf.mxu2 }
 0x3cf   : > { %v1551_v44 = vrot.slane %v1494_v43, 4  ;;  %v1550_v47 = vsel %vm997_vm0, %v1549_v46, %v1494_v43 }
 0x3d0   : > { %v1556_v13 = vperm.slane %v1550_v47, %v3595_v10  ;;  %v2698_v47 = vld [vmem:[%s3479_s12 + $0x28] sm:$0xff] }
 0x3d1   : > { %v1552_v7 = vsel %vm997_vm0, %v1532_v39, %v1551_v44 }
 0x3d2   : > { %v1560_v49 = vperm.slane %v1552_v7, %v3595_v10  ;;  %v1561_v59 = vrot.slane %v1556_v13, 4  ;;  %v2700_v7 = vld [vmem:[%s3479_s12 + $0x38] sm:$0xff] }
 0x3d3   : > { %1733 = vmatpush.bf16.msrb.mxu1 %v2700_v7 }
 0x3d4   : > { %v1573_v56 = vrot.slane %v1560_v49, 4 }
 0x3d6   : > { %v1496_v45 = vpop.f32.mrf.mxu2 }
 0x3de   : > { %v1513_v53 = vpop.f32.mrf.mxu3 }
 0x3df   : > { %v1536_v54 = vrot.slane %v1513_v53, 4  ;;  %v1540_v55 = vsel %vm997_vm0, %v1513_v53, %v1539_v52  ;;  %v2696_v52 = vld [vmem:[%s3479_s12 + $0x18] sm:$0xff]  ;;  %v2694_v53 = vld [vmem:[%s3479_s12 + $0x8] sm:$0xff] }
 0x3e0   : > { %v1548_v57 = vperm.slane %v1540_v55, %v3595_v10 }
 0x3e1   : > { %v1538_v58 = vsel %vm997_vm0, %v1536_v54, %v1475_v3  ;;  %v2693_v54 = vld [vmem:[%s3479_s12] sm:$0xff] }
 0x3e2   : > { %v1544_v51 = vperm.slane %v1538_v58, %v3595_v10  ;;  %v1574_v60 = vsel %vm997_vm0, %v1573_v56, %v1548_v57  ;;  %v1575_v61 = vrot.slane %v1548_v57, 4 }
 0x3e3   : > { %v1580_v62 = vperm.slane %v1574_v60, %v3607_v41 }
 0x3e4   : > { %v1562_v63 = vsel %vm997_vm0, %v1561_v59, %v1544_v51  ;;  %v1563_v1 = vrot.slane %v1544_v51, 4  ;;  %v1576_v2 = vsel %vm997_vm0, %v1560_v49, %v1575_v61  ;;  %v2697_v49 = vld [vmem:[%s3479_s12 + $0x20] sm:$0xff]  ;;  %v2871_v61 = vld [vmem:[%s730_s14] ss:$0 sm:$0xff] }
 0x3e5   : > { %v1568_v4 = vperm.slane %v1562_v63, %v3607_v41  ;;  %v1584_v5 = vperm.slane %v1576_v2, %v3607_v41  ;;  %v1589_v11 = vrot.slane %v1580_v62, 4 }
 0x3e6   : > { %v1564_v6 = vsel %vm997_vm0, %v1556_v13, %v1563_v1  ;;  %v1515_v8 = vpop.f32.mrf.mxu3  ;;  %v2695_v13 = vld [vmem:[%s3479_s12 + $0x10] sm:$0xff] }
 0x3e7   : > { %v1572_v9 = vperm.slane %v1564_v6, %v3607_v41  ;;  %v1591_v12 = vrot.slane %v1584_v5, 4  ;;  %v1585_v14 = vrot.slane %v1568_v4, 4  ;;  %v1590_v21 = vsel %vm997_vm0, 0.0, %v1589_v11  ;;  %v2591_v5 = vld [vmem:[%s3481_s19 + $0x70] sm:$0xf] }
 0x3e8   : > { %v2716_v6 = vld [vmem:[%s3481_s19 + $0x74] sm:$0xf0]  ;;  %v2715_v8 = vld [vmem:[%s3481_s19 + $0x74] sm:$0xf]  ;;  %v2593_v11 = vld [vmem:[%s3481_s19 + $0x78] sm:$0xf0] }
 0x3e9   : > { %v1587_v15 = vrot.slane %v1572_v9, 4  ;;  %v1592_v16 = vsel %vm997_vm0, 0.0, %v1591_v12  ;;  %v1604_v17 = vsel %vm997_vm0, %v1591_v12, %v1580_v62  ;;  %v1586_v27 = vsel %vm997_vm0, 0.0, %v1585_v14 }
 0x3ea   : > { %v1608_v18 = vperm.slane %v1604_v17, %v3595_v10  ;;  %v1609_v19 = vrot.slane %v1592_v16, 4  ;;  %v2592_v9 = vor.u32 %v2716_v6, %v2591_v5  ;;  %v2596_v12 = vor.u32 %v2715_v8, %v2593_v11  ;;  %v2722_v6 = vld [vmem:[%s3527_s30 + $0x28] sm:$0xff]  ;;  %v2729_v11 = vld [vmem:[%s3527_s30 + $0x60] sm:$0xff] }
 0x3eb   : > { %v1588_v20 = vsel %vm997_vm0, 0.0, %v1587_v15  ;;  %v1593_v22 = vsel %vm997_vm0, %v1587_v15, %v1568_v4  ;;  %v3192_v4 = vmov 128.0   ;;  %v2730_v8 = vld [vmem:[%s3527_s30 + $0x68] sm:$0xff] }
 0x3ec   : > { %v1610_v23 = vsel %vm997_vm0, %v1609_v19, %v1590_v21  ;;  %v1597_v24 = vperm.slane %v1593_v22, %v3595_v10  ;;  %v1598_v25 = vrot.slane %v1588_v20, 4  ;;  %v1629_v26 = vrot.slane %v1608_v18, 4  ;;  %1887 = vmatpush.bf16.msrb.mxu2 %v2592_v9  ;;  %1900 = vmatpush.bf16.msra.mxu3 %v2596_v12  ;;  %v2721_v9 = vld [vmem:[%s3527_s30 + $0x20] sm:$0xff] }
 0x3ed   : > { %v1614_v28 = vperm.slane %v1610_v23, %v3595_v10  ;;  %2893 = vrcp.f32 %v3192_v4  ;;  %v2583_v23 = vld [vmem:[%s3481_s19 + $0x60] sm:$0xf]  ;;  %v2731_v4 = vld [vmem:[%s3527_s30 + $0x70] sm:$0xff] }
 0x3ee   : > { %v1599_v29 = vsel %vm997_vm0, %v1598_v25, %v1586_v27  ;;  %v1617_v30 = vrot.slane %v1597_v24, 4  ;;  %v2713_v25 = vld [vmem:[%s3481_s19 + $0x64] sm:$0xf]  ;;  %v2585_v27 = vld [vmem:[%s3481_s19 + $0x68] sm:$0xf0] }
 0x3ef   : > { %v1603_v31 = vperm.slane %v1599_v29, %v3595_v10  ;;  %v1630_v32 = vsel %vm997_vm0, %v1614_v28, %v1629_v26  ;;  %v1627_v33 = vrot.slane %v1614_v28, 4  ;;  %v2588_v28 = vor.u32 %v2713_v25, %v2585_v27  ;;  %v2575_v29 = vld [vmem:[%s3481_s19 + $0x50] sm:$0xf]  ;;  %v2873_v27 = vld [vmem:[%s4035_s2] ss:$0 sm:$0xff] }
 0x3f0   : > { %v1638_v34 = vperm.slane %v1630_v32, %v3607_v41 }
 0x3f1   : > { %v1618_v35 = vsel %vm997_vm0, %v1603_v31, %v1617_v30  ;;  %v1615_v36 = vrot.slane %v1603_v31, 4  ;;  %v1628_v0 = vsel %vm997_vm0, %v1627_v33, %v1608_v18  ;;  %1901 = vmatpush.bf16.msra.mxu3 %v2588_v28  ;;  %v2712_v30 = vld [vmem:[%s3481_s19 + $0x54] sm:$0xf0]  ;;  %v2711_v31 = vld [vmem:[%s3481_s19 + $0x54] sm:$0xf] }
 0x3f2   : > { %v1626_v37 = vperm.slane %v1618_v35, %v3607_v41  ;;  %v1643_v38 = vrot.slane %v1638_v34, 4  ;;  %v1634_v50 = vperm.slane %v1628_v0, %v3607_v41  ;;  %v2576_v32 = vor.u32 %v2712_v30, %v2575_v29  ;;  %v2577_v33 = vld [vmem:[%s3481_s19 + $0x58] sm:$0xf0]  ;;  %v2567_v35 = vld [vmem:[%s3481_s19 + $0x40] sm:$0xf] }
 0x3f3   : > { %v1616_v3 = vsel %vm997_vm0, %v1615_v36, %v1597_v24  ;;  %v2894_v14 = vpop.eup %2893  ;;  %v2714_v24 = vld [vmem:[%s3481_s19 + $0x64] sm:$0xf0]  ;;  %v2709_v0 = vld [vmem:[%s3481_s19 + $0x44] sm:$0xf] }
 0x3f4   : > { %v1644_v10 = vsel %vm997_vm0, %v1643_v38, %v1626_v37  ;;  %v1645_v39 = vrot.slane %v1626_v37, 4  ;;  %v1622_v40 = vperm.slane %v1616_v3, %v3607_v41  ;;  %v1639_v42 = vrot.slane %v1634_v50, 4  ;;  %v2699_v41 = vld [vmem:[%s3479_s12 + $0x30] sm:$0xff]  ;;  %v2710_v36 = vld [vmem:[%s3481_s19 + $0x44] sm:$0xf0]  ;;  %s4032_s12 = sld [smem:[#allocation38_spill]] }
 0x3f5   : > { %1652 = vrot.lane.b32.xlu0 %v1644_v10, %s3189_s28  ;;  %1734 = vmatpush.bf16.msrb.mxu1 %v2699_v41  ;;  %v1752_v15 = vmul.f32 128.0, %v2894_v14  ;;  %vm1756_vm6 = vweird.f32 %v2894_v14  ;;  %v2584_v26 = vor.u32 %v2714_v24, %v2583_v23  ;;  %v2568_v37 = vor.u32 %v2710_v36, %v2567_v35  ;;  %v2569_v38 = vld [vmem:[%s3481_s19 + $0x48] sm:$0xf0]  ;;  %v2559_v3 = vld [vmem:[%s3481_s19 + $0x30] sm:$0xf] }
 0x3f6   : > { %v1646_v43 = vsel %vm997_vm0, %v1638_v34, %v1645_v39  ;;  %v1641_v44 = vrot.slane %v1622_v40, 4  ;;  %v1640_v45 = vsel %vm997_vm0, %v1639_v42, %v1622_v40  ;;  %v2580_v34 = vor.u32 %v2711_v31, %v2577_v33  ;;  %v2708_v10 = vld [vmem:[%s3481_s19 + $0x34] sm:$0xf0]  ;;  %v2707_v39 = vld [vmem:[%s3481_s19 + $0x34] sm:$0xf]  ;;  %v2718_v31 = vld [vmem:[%s3527_s30 + $0x8] sm:$0xff] }
 0x3f7   : > { %1656 = vrot.lane.b32.xlu2 %v1646_v43, %s3188_s3  ;;  %v1753_v16 = vsub.f32 1.0, %v1752_v15  ;;  %1888 = vmatpush.bf16.msrb.mxu2 %v2584_v26  ;;  %v2560_v40 = vor.u32 %v2708_v10, %v2559_v3  ;;  %v2561_v42 = vld [vmem:[%s3481_s19 + $0x38] sm:$0xf0]  ;;  %v2553_v41 = vld [vmem:[%s3481_s19 + $0x28] sm:$0xf0]  ;;  %v2717_v33 = vld [vmem:[%s3527_s30] sm:$0xff] }
 0x3f8   : > { %v1642_v46 = vsel %vm997_vm0, %v1634_v50, %v1641_v44  ;;  %1902 = vmatpush.bf16.msra.mxu3 %v2580_v34  ;;  %v2572_v50 = vor.u32 %v2709_v0, %v2569_v38  ;;  %v2564_v43 = vor.u32 %v2707_v39, %v2561_v42  ;;  %v2551_v44 = vld [vmem:[%s3481_s19 + $0x20] sm:$0xf]  ;;  %v2720_v15 = vld [vmem:[%s3527_s30 + $0x18] sm:$0xff] }
 0x3f9   : > { %1648 = vrot.lane.b32.xlu1 %v1642_v46, %s3187_s26  ;;  %1735 = vmatpush.bf16.msrb.mxu1 %v2698_v47  ;;  %v2705_v46 = vld [vmem:[%s3481_s19 + $0x24] sm:$0xf] }
 0x3fa   : > { %v2556_v47 = vor.u32 %v2705_v46, %v2553_v41  ;;  %v2725_v34 = vld [vmem:[%s3527_s30 + $0x40] sm:$0xff] }
 0x3fb   : > { %1889 = vmatpush.bf16.msrb.mxu2 %v2576_v32  ;;  %v2726_v32 = vld [vmem:[%s3527_s30 + $0x48] sm:$0xff] }
 0x3fc   : > { %1903 = vmatpush.bf16.msra.mxu3 %v2572_v50 }
 0x3fd   : > { %1736 = vmatpush.bf16.msrb.mxu1 %v2697_v49  ;;  %v2543_v49 = vld [vmem:[%s3481_s19 + $0x10] sm:$0xf] }
 0x3ff   : > { %1890 = vmatpush.bf16.msrb.mxu2 %v2568_v37 }
 0x400   : > { %1904 = vmatpush.bf16.msra.mxu3 %v2564_v43 }
 0x401   : > { %1737 = vmatpush.bf16.msrb.mxu1 %v2696_v52  ;;  %v2704_v52 = vld [vmem:[%s3481_s19 + $0x14] sm:$0xf0] }
 0x403   : > { %1891 = vmatpush.bf16.msrb.mxu2 %v2560_v40 }
 0x404   : > { %1905 = vmatpush.bf16.msra.mxu3 %v2556_v47 }
 0x405   : > { %1738 = vmatpush.bf16.msrb.mxu1 %v2695_v13  ;;  %v2703_v13 = vld [vmem:[%s3481_s19 + $0x14] sm:$0xf] }
 0x409   : > { %1739 = vmatpush.bf16.msrb.mxu1 %v2694_v53  ;;  %v2544_v53 = vor.u32 %v2704_v52, %v2543_v49 }
 0x40d   : > { %1740 = vmatpush.bf16.msrb.mxu1 %v2693_v54  ;;  %v2545_v54 = vld [vmem:[%s3481_s19 + $0x18] sm:$0xf0] }
 0x451   : > { %v1657_v58 = vpop.permute.xlu2 %1656 }
 0x467   : > { %v1653_v56 = vpop.permute.xlu0 %1652 }
 0x46b   : > { %v1649_v55 = vpop.permute.xlu1 %1648 }
 0x46c   : > { %v1659_v57 = vsel %vm1333_vm1, %v1640_v45, %v1649_v55  ;;  %v2706_v45 = vld [vmem:[%s3481_s19 + $0x24] sm:$0xf0]  ;;  %v2548_v55 = vor.u32 %v2703_v13, %v2545_v54 }
 0x46d   : > { %v1661_v59 = vsel %vm1660_vm4, %v1659_v57, %v1653_v56  ;;  %v2552_v7 = vor.u32 %v2706_v45, %v2551_v44  ;;  %v2535_v56 = vld [vmem:[%s3481_s19] sm:$0xf]  ;;  %v2702_v57 = vld [vmem:[%s3481_s19 + $0x4] sm:$0xf0] }
 0x46e   : > { %v1663_v51 = vsel %vm1662_vm5, %v1661_v59, %v1657_v58  ;;  %v2701_v58 = vld [vmem:[%s3481_s19 + $0x4] sm:$0xf]  ;;  %v2537_v59 = vld [vmem:[%s3481_s19 + $0x8] sm:$0xf0]  ;;  %1906 = vmatpush.bf16.msra.mxu3 %v2548_v55  ;;  %s4033_s19 = scalar_lea.vmem %s4032_s12, %s3489_s5  ;;  %v2874_v44 = vld [vmem:[%s743_s7] ss:$0 sm:$0xff] }
 0x46f   : > { %v1664_v60 = vpack.c.bf16 %v1663_v51, %v1663_v51  ;;  %1892 = vmatpush.bf16.msrb.mxu2 %v2552_v7  ;;  %v2536_v51 = vor.u32 %v2702_v57, %v2535_v56  ;;  %v2872_v24 = vld [vmem:[%s4033_s19] ss:$0 sm:$0xff] }
 0x471   : > { %1741 = vmatmul.bf16.vlgmr.msrb.gmra.mxu1 %v1664_v60  ;;  %v2540_v60 = vor.u32 %v2701_v58, %v2537_v59 }
 0x473   : > { %1893 = vmatpush.bf16.msrb.mxu2 %v2544_v53  ;;  %1907 = vmatpush.bf16.msra.mxu3 %v2540_v60 }
 0x477   : > { %1894 = vmatpush.bf16.msrb.mxu2 %v2536_v51 }
 0x4ee   : > { %v1742_v62 = vpop.f32.mrf.mxu1 }
 0x4ef   : > { %v1743_v63 = vadd.f32 %v2871_v61, %v1742_v62  ;;  %v2724_v61 = vld [vmem:[%s3527_s30 + $0x38] sm:$0xff] }
 0x4f0   : > { %v2732_v62 = vld [vmem:[%s3527_s30 + $0x78] sm:$0xff]  ;;  %2049 = vmatpush.bf16.msrb.mxu0 %v2724_v61 }
 0x4f1   : > { %v1746_v1 = vadd.f32 %v1743_v63, %v3567_v48  ;;  %v1754_v48 = vmul.f32 %v2894_v14, %v1753_v16  ;;  %2062 = vmatpush.bf16.msra.mxu1 %v2732_v62 }
 0x4f3   : > { %1749 = vadd.xlane.f32.xlu0 %v1746_v1  ;;  %v1755_v17 = vadd.f32 %v2894_v14, %v1754_v48  ;;  %v2728_v48 = vld [vmem:[%s3527_s30 + $0x58] sm:$0xff] }
 0x4f5   : > { %v3810_v18 = vsel %vm1756_vm6, %v2894_v14, %v1755_v17  ;;  %2063 = vmatpush.bf16.msra.mxu1 %v2731_v4 }
 0x4f6   : > { %v1744_v2 = vpop.f32.mrf.mxu1 }
 0x4f7   : > { %v2723_v2 = vld [vmem:[%s3527_s30 + $0x30] sm:$0xff] }
 0x4f8   : > { %2050 = vmatpush.bf16.msrb.mxu0 %v2723_v2 }
 0x4f9   : > { %2064 = vmatpush.bf16.msra.mxu1 %v2730_v8 }
 0x4fc   : > { %2051 = vmatpush.bf16.msrb.mxu0 %v2722_v6 }
 0x4fd   : > { %2065 = vmatpush.bf16.msra.mxu1 %v2729_v11 }
 0x500   : > { %2052 = vmatpush.bf16.msrb.mxu0 %v2721_v9 }
 0x501   : > { %2066 = vmatpush.bf16.msra.mxu1 %v2728_v48 }
 0x504   : > { %2053 = vmatpush.bf16.msrb.mxu0 %v2720_v15 }
 0x566   : > { %v1750_v19 = vpop.xlane.xlu0 %1749 }
 0x567   : > { %v1758_v20 = vmul.f32 %v3810_v18, %v1750_v19  ;;  %v2719_v19 = vld [vmem:[%s3527_s30 + $0x10] sm:$0xff] }
 0x568   : > { %2054 = vmatpush.bf16.msrb.mxu0 %v2719_v19 }
 0x569   : > { %v3813_v21 = vsub.f32 %v1746_v1, %v1758_v20 }
 0x56b   : > { %v1760_v22 = vmul.f32 %v3813_v21, %v3813_v21 }
 0x56c   : > { %2055 = vmatpush.bf16.msrb.mxu0 %v2718_v31 }
 0x56d   : > { %1761 = vadd.xlane.f32.xlu1 %v1760_v22  ;;  %v2727_v22 = vld [vmem:[%s3527_s30 + $0x50] sm:$0xff]  ;;  %s4039_s30 = sld [smem:[#allocation22_spill]] }
 0x56e   : > { %2067 = vmatpush.bf16.msra.mxu1 %v2727_v22 }
 0x570   : > { %2056 = vmatpush.bf16.msrb.mxu0 %v2717_v33 }
 0x572   : > { %2068 = vmatpush.bf16.msra.mxu1 %v2726_v32 }
 0x573   : > { %p2661_p7 = scmp.ne.s32.totalorder %s4039_s30, 1 }
 0x576   : > { %2069 = vmatpush.bf16.msra.mxu1 %v2725_v34 }
 0x5e0   : > { %v1762_v63 = vpop.xlane.xlu1 %1761 }
 0x5e1   : > { %v1763_v1 = vmul.f32 %v1762_v63, %v3810_v18 }
 0x5e3   : > { %v1764_v5 = vadd.f32 1e-06, %v1763_v1  ;;  %v2875_v1 = vld [vmem:[%s746_s8] ss:$0 sm:$0xff] }
 0x5e5   : > { %2895 = vrsqrt.f32 %v1764_v5  ;;  %vm1771_vm8 = vweird.f32 %v1764_v5 }
 0x5eb   : > { %v2896_v12 = vpop.eup %2895 }
 0x5ec   : > { %v1766_v14 = vmul.f32 %v2896_v12, %v1764_v5  ;;  %vm1772_vm7 = vweird.f32 %v2896_v12 }
 0x5ed   : > { %vm1773_vm9 = vmor %vm1771_vm8, %vm1772_vm7 }
 0x5ee   : > { %v1767_v16 = vmul.f32 %v2896_v12, %v1766_v14 }
 0x5f0   : > { %v1768_v17 = vmul.f32 0.5, %v1767_v16 }
 0x5f2   : > { %v1769_v20 = vsub.f32 1.5, %v1768_v17 }
 0x5f4   : > { %v1770_v23 = vmul.f32 %v2896_v12, %v1769_v20 }
 0x5f6   : > { %v1774_v25 = vsel %vm1773_vm9, %v2896_v12, %v1770_v23 }
 0x5f7   : > { %v1775_v26 = vmul.f32 %v1774_v25, %v3813_v21  ;;  %v1801_v21 = vld [vmem:[%s3513_s18] sm:$0x3] }
 0x5f8   : > { %v1803_v35 = vperm.slane %v1801_v21, 0  ;;  %v1804_v36 = vperm.slane %v1801_v21, 1 }
 0x5f9   : > { %v1779_v28 = vmul.f32 %v2872_v24, %v1775_v26 }
 0x5fb   : > { %v1783_v29 = vadd.f32 %v2873_v27, %v1779_v28 }
 0x5fd   : > { %v1784_v30 = vpack.c.bf16 %v1783_v29, %v1783_v29 }
 0x5ff   : > { %1895 = vmatmul.bf16.vlgmr.msrb.gmra.mxu2 %v1784_v30  ;;  %1908 = vmatmul.bf16.vlgmr.msra.gmra.mxu3 %v1784_v30 }
 0x682   : > { %v1896_v0 = vpop.f32.mrf.mxu2  ;;  %v1909_v37 = vpop.f32.mrf.mxu3 }
 0x683   : > { %v1897_v38 = vadd.f32 %v1896_v0, %v1803_v35  ;;  %v1910_v50 = vadd.f32 %v1909_v37, %v1804_v36 }
 0x685   : > { %v1913_v3 = vmax.f32 %v1897_v38, 0.0  ;;  %v1914_v10 = vmax.f32 %v1910_v50, 0.0 }
 0x687   : > { %v1915_v39 = vpack.c.bf16 %v1913_v3, %v1913_v3  ;;  %v1916_v40 = vpack.c.bf16 %v1914_v10, %v1914_v10 }
 0x689   : > { %2057 = vmatmul.bf16.vlgmr.msrb.gmra.mxu0 %v1915_v39  ;;  %2070 = vmatmul.bf16.vlgmr.msra.gmra.mxu1 %v1916_v40 }
 0x68a   : > { %v1898_v42 = vpop.f32.mrf.mxu2  ;;  %v1911_v43 = vpop.f32.mrf.mxu3 }
 0x706   : > { %v2058_v45 = vpop.f32.mrf.mxu0  ;;  %v2071_v46 = vpop.f32.mrf.mxu1 }
 0x707   : > { %v2059_v7 = vadd.f32 %v2874_v44, %v2058_v45 }
 0x709   : > { %v2072_v41 = vadd.f32 %v2071_v46, %v2059_v7 }
 0x70b   : > { %v2075_v47 = vadd.f32 %v2072_v41, %v1783_v29 }
 0x70d   : > { %2078 = vadd.xlane.f32.xlu2 %v2075_v47 }
 0x70e   : > { %v2060_v49 = vpop.f32.mrf.mxu0  ;;  %v2073_v52 = vpop.f32.mrf.mxu1 }
 0x780   : > { %v2079_v13 = vpop.xlane.xlu2 %2078 }
 0x781   : > { %v2080_v53 = vmul.f32 %v2079_v13, %v3810_v18 }
 0x783   : > { %v2081_v54 = vsub.f32 %v2075_v47, %v2080_v53 }
 0x785   : > { %v2082_v55 = vmul.f32 %v2081_v54, %v2081_v54 }
 0x787   : > { %2083 = vadd.xlane.f32.xlu0 %v2082_v55 }
 0x7fa   : > { %v2084_v56 = vpop.xlane.xlu0 %2083 }
 0x7fb   : > { %v2085_v57 = vmul.f32 %v2084_v56, %v3810_v18  ;;  %v2876_v18 = vld [vmem:[%s749_s22] ss:$0 sm:$0xff] }
 0x7fd   : > { %v2086_v58 = vadd.f32 1e-06, %v2085_v57 }
 0x7ff   : > { %2897 = vrsqrt.f32 %v2086_v58  ;;  %vm2093_vm11 = vweird.f32 %v2086_v58 }
 0x805   : > { %v2898_v59 = vpop.eup %2897 }
 0x806   : > { %v2088_v51 = vmul.f32 %v2898_v59, %v2086_v58  ;;  %vm2094_vm10 = vweird.f32 %v2898_v59 }
 0x807   : > { %vm2095_vm12 = vmor %vm2093_vm11, %vm2094_vm10 }
 0x808   : > { %v2089_v60 = vmul.f32 %v2898_v59, %v2088_v51 }
 0x80a   : > { %v2090_v61 = vmul.f32 0.5, %v2089_v60 }
 0x80c   : > { %v2091_v62 = vsub.f32 1.5, %v2090_v61 }
 0x80e   : > { %v2092_v63 = vmul.f32 %v2898_v59, %v2091_v62 }
 0x810   : > { %v2096_v2 = vsel %vm2095_vm12, %v2898_v59, %v2092_v63 }
 0x811   : > { %v2097_v4 = vmul.f32 %v2096_v2, %v2081_v54 }
 0x813   : > { %v2101_v5 = vmul.f32 %v2875_v1, %v2097_v4  ;;  %2110 = sbr.rel (%p2661_p7) target bundleno = 2073 (0x819), region = 100 }
 0x815   : > { %v2105_v6 = vadd.f32 %v2876_v18, %v2101_v5 }
 0x817   : > { %2106 = vst [vmem:[#allocation2] sm:$0xff] %v2105_v6 }
 0x818   : > { %2111 = vst [vmem:[%s3531_s15] sm:$0xff] %v2105_v6 }
 0x819 PF: > { %s4040_s23 = sld [smem:[#allocation23_spill]]  ;;  %s2125_s22 = sshll.u32 %s3531_s15, 4  ;;  %s2126_s22 = int_to_ptr.vmem [resolvable:$true] %s2125_s22 }
 0x81a   : > { %s4041_s28 = sld [smem:[#allocation46_spill]]  ;;  %s2113_s16 = scalar_lea.sflag [#allocation5], %s3459_s27 }
 0x81f   : > { %s2663_s8 = sshll.u32 %s4040_s23, 3 }
 0x820   : > { %s4042_s21 = smov %s4041_s28  ;;  %s2123_s5 = scalar_lea.hbm %s4041_s28, %s2663_s8 }
 0x821   : > { %s2127_s29 = sshll.u32 %s2123_s5, 4  ;;  %s3069_s1 = scalar_lea.hbm %s4042_s21, 16  ;;  %s2128_s29 = int_to_ptr.hbm [resolvable:$true] %s2127_s29 }
 0x822   : > { %s3063_s20 = sshra.s32 %s2128_s29, 4  ;;  %s3064_s20 = int_to_ptr.hbm [resolvable:$true] %s3063_s20 }
 0x823   : > { %s3065_s10 = scalar_lea.hbm %s3064_s20, 8  ;;  %p3070_p0 = scmp.lt.s32.totalorder %s3064_s20, %s4042_s21 }
 0x824   : > { %p3066_p10 = scmp.ne.s32.totalorder %s3064_s20, %s3065_s10  ;;  %p3071_p5 = scmp.lt.s32.totalorder %s3069_s1, %s3065_s10 }
 0x826   : > { %p3067_p11 = pnand %p3066_p10, %p3423_p12  ;;  %p3072_p6 = por %p3071_p5, %p3070_p0 }
 0x828   : > { %p3068_p3 = pneg %p3067_p11 }
 0x82a   : > { %p3073_p8 = pnand %p3072_p6, %p3068_p3 }
 0x82c   : > { %3076 = shalt.err (!%p3073_p8)
}
 0x82d   : > { %2747 = dma.vmem_to_hbm [thread:$0]  (%p3423_p12), %s2126_s22, 128, %s2128_s29, %s2113_s16  }
 0x82e PF: > { %s4043_s27 = sld [smem:[#allocation26_spill]] }
 0x82f   : > { %s4044_s15 = sld [smem:[#allocation19_spill]] }
 0x834   : > { %p2770_p13 = scmp.ge.s32.totalorder %s4043_s27, 2 }
 0x835   : > { %s2139_s11 = sand.u32 1, %s4044_s15  }
 0x836   : > { %p2766_p9 = pnand %p2770_p13, %p3432_p1  ;;  %s2140_s4 = scalar_lea.sflag [#allocation5], %s2139_s11 }
 0x838   : > { %p2767_p2 = pneg %p2766_p9 }
 0x83a   : > { %3134 = dma.done.wait (%p2767_p2), %s2140_s4, 128  }
 0x83b   : > { %3136 = vsyncadd (%p2767_p2), %s2140_s4, 4294967168  ;;  %s35_s18 = sadd.s32 1, %s4043_s27   ;;  %s4046_s25 = sld [smem:[#allocation17_spill]] }
 0x83c   : > { %p32_p4 = scmp.ge.s32.totalorder %s35_s18, 6   ;;  %s4047_s26 = sld [smem:[#allocation18_spill]] }
 0x83d   : > { %s4048_s27 = sld [smem:[#allocation30_spill]] }
 0x83e   : > { %s4049_s28 = sld [smem:[#allocation20_spill]] }
 0x83f   : > { %s4050_s29 = sld [smem:[#allocation21_spill]] }
 0x840   : > { %s4051_s30 = sld [smem:[#allocation31_spill]]  ;;  %34 = sbr.rel (!%p32_p4) target bundleno = 28 (0x1c), region = 197 }
 0x841   : > { %s4052_s14 = sld [smem:[#allocation24_spill]] }
 0x842   : > { %s4053_s15 = sld [smem:[#allocation25_spill]] }
 0x843   : > { %s4054_s16 = sld [smem:[#allocation27_spill]] }
 0x844   : > { %s4055_s17 = sld [smem:[#allocation28_spill]] }
 0x845   :  { %2146 = vsyncpa [#allocation4], 1 }
 0x846   :  { %2148 = vsyncpa [#allocation4 + $0x1], 1 }
 0x847   :  { %2149 = vsyncpa [#allocation7], 1 }
 0x848   :  { %2151 = vsyncpa [#allocation7 + $0x1], 1 }
 0x849   :  { %2152 = vsyncpa [#allocation10], 1 }
 0x84a   :  { %2154 = vsyncpa [#allocation10 + $0x1], 1 }
 0x84b   :  { %2155 = vsyncpa [#allocation5], 1 }
 0x84c   :  { %2157 = vsyncpa [#allocation5 + $0x1], 1 }

</bundles_post_ra>
